<compile_context>
chip_gen: v6e
topology: v6e:2x2x1
jax: 0.10.0
libtpu: 0.0.40
codegen_flags: <defaults>
</compile_context>

<pallas_src>
import functools

import jax
import jax.numpy as jnp
import numpy as np
from jax.experimental import pallas as pl
from jax.experimental.pallas import tpu as pltpu

EPS = 1e-5


def res_block_kernel(x_ref, wb1_ref, wb2_ref, srow_ref, p_ref,
                     g1_ref, b1_ref, g2_ref, b2_ref, out_ref,
                     *, inv_count, conv_dtype):
    """Whole residual block on one lane-dense (B*H, W*C) tile."""
    x = x_ref[...]                                    # (BH, WC) float32
    bh = x.shape[0]
    ones_row = jnp.ones((1, bh), jnp.float32)         # row reduction via MXU
    s_up = srow_ref[0]                                # row i <- row i-1 (0 at h == 0)
    s_dn = srow_ref[1]                                # row i <- row i+1 (0 at h == H-1)

    def conv3x3(y, wb_ref):
        # 3 lane-dense MXU contractions, one per kh tap.  The kw taps, the
        # channel mixing and the W zero-padding live in the banded weights;
        # the H shift + boundary zeroing lives in the block-diagonal shift
        # matrices (no padded scratch, no masked halo stores).
        yc = y.astype(conv_dtype)
        up = jnp.dot(s_up, yc, preferred_element_type=jnp.float32).astype(conv_dtype)
        dn = jnp.dot(s_dn, yc, preferred_element_type=jnp.float32).astype(conv_dtype)
        acc = jnp.dot(up, wb_ref[0], preferred_element_type=jnp.float32)
        acc = acc + jnp.dot(yc, wb_ref[1], preferred_element_type=jnp.float32)
        acc = acc + jnp.dot(dn, wb_ref[2], preferred_element_type=jnp.float32)
        return acc

    def batchnorm(y, gamma_ref, beta_ref):
        # Training-mode BN: biased per-channel stats over (N, H, W), all in
        # f32.  The ones-row matmul does the row reduction; P folds the W
        # lane-groups per channel and broadcasts the result back onto the
        # packed (w, c) lane layout.
        p = p_ref[...]
        row_sum = jnp.dot(ones_row, y, preferred_element_type=jnp.float32)    # (1, WC)
        mean = jnp.dot(row_sum, p, preferred_element_type=jnp.float32) * inv_count
        cen = y - mean
        sq_sum = jnp.dot(ones_row, cen * cen, preferred_element_type=jnp.float32)
        var = jnp.dot(sq_sum, p, preferred_element_type=jnp.float32) * inv_count
        return cen * jax.lax.rsqrt(var + EPS) * gamma_ref[...] + beta_ref[...]

    y1 = jnp.maximum(batchnorm(conv3x3(x, wb1_ref), g1_ref, b1_ref), 0.0)
    y2 = batchnorm(conv3x3(y1, wb2_ref), g2_ref, b2_ref)
    out_ref[...] = jnp.maximum(y2 + x, 0.0).astype(out_ref.dtype)


def _banded_conv_weights(w_hwio, width):
    """(3, W*Cin, W*Cout): fold the kw taps, channel mixing and W-boundary
    zero padding of a 3x3 / pad-1 conv into one banded matrix per kh tap."""
    mats = []
    for kh in range(3):
        m = sum(jnp.kron(jnp.eye(width, k=-(kw - 1), dtype=jnp.float32),
                         w_hwio[kh, kw].astype(jnp.float32))
                for kw in range(3))
        mats.append(m)
    return jnp.stack(mats, axis=0)


def _row_shift_matrices(batch, height, dtype):
    """(2, B*H, B*H): within-image row shifts (h-1 and h+1) with zero rows at
    the image boundaries, as block-diagonal 0/1 matrices."""
    eye_b = jnp.eye(batch, dtype=dtype)
    up = jnp.kron(eye_b, jnp.eye(height, k=-1, dtype=dtype))
    dn = jnp.kron(eye_b, jnp.eye(height, k=1, dtype=dtype))
    return jnp.stack([up, dn], axis=0)


def _channel_fold_matrix(width, channels):
    """(W*C, W*C): sums per-channel values over the W lane-groups and
    broadcasts the per-channel result back to every (w, c) lane position."""
    return jnp.kron(jnp.ones((width, width), jnp.float32),
                    jnp.eye(channels, dtype=jnp.float32))


def res_block(x_nchw, w1_hwio, w2_hwio, gamma1, beta1, gamma2, beta2,
              conv_dtype=jnp.float32):
    """w1_hwio, w2_hwio: (3, 3, C, C) HWIO conv weights (stride 1, pad 1, no bias)."""
    B, C, H, W = x_nchw.shape
    WC = W * C

    # Packed lane-dense layout: rows = (b, h), lanes = (w, c).  No spatial
    # padding in HBM -- boundaries are handled by the banded / shift matrices.
    x2 = jnp.transpose(x_nchw, (0, 2, 3, 1)).reshape(B * H, WC).astype(jnp.float32)

    wb1 = _banded_conv_weights(w1_hwio, W).astype(conv_dtype)
    wb2 = _banded_conv_weights(w2_hwio, W).astype(conv_dtype)
    srows = _row_shift_matrices(B, H, conv_dtype)
    p = _channel_fold_matrix(W, C)
    g1 = jnp.tile(gamma1.astype(jnp.float32), W).reshape(1, WC)
    b1 = jnp.tile(beta1.astype(jnp.float32), W).reshape(1, WC)
    g2 = jnp.tile(gamma2.astype(jnp.float32), W).reshape(1, WC)
    b2 = jnp.tile(beta2.astype(jnp.float32), W).reshape(1, WC)

    vmem = pl.BlockSpec(memory_space=pltpu.MemorySpace.VMEM)
    kernel = functools.partial(res_block_kernel,
                               inv_count=1.0 / float(B * H * W),
                               conv_dtype=conv_dtype)
    out2 = pl.pallas_call(
        kernel,
        out_shape=jax.ShapeDtypeStruct((B * H, WC), jnp.float32),
        in_specs=[vmem] * 9,
        out_specs=vmem,
    )(x2, wb1, wb2, srows, p, g1, b1, g2, b2)

    return jnp.transpose(out2.reshape(B, H, W, C), (0, 3, 1, 2))   # back to NCHW


def res_block_reference(x_nchw, w1, w2, gamma1, beta1, gamma2, beta2):
    x = jnp.transpose(x_nchw, (0, 2, 3, 1)).astype(jnp.float32)

    def conv(y, w):
        return jax.lax.conv_general_dilated(
            y, w, window_strides=(1, 1), padding="SAME",
            dimension_numbers=("NHWC", "HWIO", "NHWC"))

    def bn(y, g, b):
        mean = jnp.mean(y, axis=(0, 1, 2), keepdims=True)
        var = jnp.mean((y - mean) ** 2, axis=(0, 1, 2), keepdims=True)
        return (y - mean) * jax.lax.rsqrt(var + EPS) * g + b

    y = jax.nn.relu(bn(conv(x, w1), gamma1, beta1))
    y = bn(conv(y, w2), gamma2, beta2)
    return jnp.transpose(jax.nn.relu(y + x), (0, 3, 1, 2))


if __name__ == "__main__":
    # W * C = 128 -> exactly one lane-dense vreg row per (b, h).
    # (Residual add requires in_channel == out_channel, as in the module's default use.)
    B, C, H, W = 2, 8, 16, 16
    key = jax.random.PRNGKey(0)
    k1, k2, k3 = jax.random.split(key, 3)

    x = jax.random.normal(k1, (B, C, H, W), jnp.float32)
    # conv weights in HWIO layout (kh, kw, Cin, Cout); deterministic init
    w1 = 0.1 * jax.random.normal(k2, (3, 3, C, C), jnp.float32)
    w2 = 0.1 * jax.random.normal(k3, (3, 3, C, C), jnp.float32)
    # BatchNorm2d affine params at PyTorch init values
    gamma1 = jnp.ones((C,), jnp.float32)
    beta1 = jnp.zeros((C,), jnp.float32)
    gamma2 = jnp.ones((C,), jnp.float32)
    beta2 = jnp.zeros((C,), jnp.float32)

    out = jax.block_until_ready(
        res_block(x, w1, w2, gamma1, beta1, gamma2, beta2))
    ref = jax.block_until_ready(
        res_block_reference(x, w1, w2, gamma1, beta1, gamma2, beta2))

    assert out.shape == (B, C, H, W)
    np.testing.assert_allclose(np.asarray(out), np.asarray(ref),
                               rtol=1e-4, atol=1e-4)
    print("KERNEL_OK")
</pallas_src>

<mosaic_0001>
module attributes {stable_mosaic.version = 11 : i64} {
  func.func @res_block_kernel(%arg0: memref<32x128xf32, #tpu.memory_space<vmem>>, %arg1: memref<3x128x128xf32, #tpu.memory_space<vmem>>, %arg2: memref<3x128x128xf32, #tpu.memory_space<vmem>>, %arg3: memref<2x32x32xf32, #tpu.memory_space<vmem>>, %arg4: memref<128x128xf32, #tpu.memory_space<vmem>>, %arg5: memref<1x128xf32, #tpu.memory_space<vmem>>, %arg6: memref<1x128xf32, #tpu.memory_space<vmem>>, %arg7: memref<1x128xf32, #tpu.memory_space<vmem>>, %arg8: memref<1x128xf32, #tpu.memory_space<vmem>>, %arg9: memref<32x128xf32, #tpu.memory_space<vmem>>) attributes {dimension_semantics = [], scalar_prefetch = 0 : i64, scratch_operands = 0 : i64, tpu.core_type = #tpu.core_type<tc>} {
    %c0 = arith.constant 0 : index
    %c0_0 = arith.constant 0 : index
    %0 = vector.load %arg0[%c0, %c0_0] : memref<32x128xf32, #tpu.memory_space<vmem>>, vector<32x128xf32>
    %cst = arith.constant 1.000000e+00 : f32
    %1 = vector.broadcast %cst : f32 to vector<1x32xf32>
    %c0_1 = arith.constant 0 : index
    %c0_2 = arith.constant 0 : index
    %c0_3 = arith.constant 0 : index
    %2 = vector.load %arg3[%c0_1, %c0_2, %c0_3] : memref<2x32x32xf32, #tpu.memory_space<vmem>>, vector<1x32x32xf32>
    %3 = vector.shape_cast %2 : vector<1x32x32xf32> to vector<32x32xf32>
    %c1 = arith.constant 1 : index
    %c0_4 = arith.constant 0 : index
    %c0_5 = arith.constant 0 : index
    %4 = vector.load %arg3[%c1, %c0_4, %c0_5] : memref<2x32x32xf32, #tpu.memory_space<vmem>>, vector<1x32x32xf32>
    %5 = vector.shape_cast %4 : vector<1x32x32xf32> to vector<32x32xf32>
    %cst_6 = arith.constant dense<0.000000e+00> : vector<32x128xf32>
    %6 = tpu.matmul %3, %0, %cst_6 {dimension_numbers = #tpu.dot_dimension_numbers<[1], [0], [0], [1], [0, 0, 1, 1], [], []>} : vector<32x32xf32>, vector<32x128xf32>, vector<32x128xf32> -> vector<32x128xf32>
    %cst_7 = arith.constant dense<0.000000e+00> : vector<32x128xf32>
    %7 = tpu.matmul %5, %0, %cst_7 {dimension_numbers = #tpu.dot_dimension_numbers<[1], [0], [0], [1], [0, 0, 1, 1], [], []>} : vector<32x32xf32>, vector<32x128xf32>, vector<32x128xf32> -> vector<32x128xf32>
    %c0_8 = arith.constant 0 : index
    %c0_9 = arith.constant 0 : index
    %c0_10 = arith.constant 0 : index
    %8 = vector.load %arg1[%c0_8, %c0_9, %c0_10] : memref<3x128x128xf32, #tpu.memory_space<vmem>>, vector<1x128x128xf32>
    %9 = vector.shape_cast %8 : vector<1x128x128xf32> to vector<128x128xf32>
    %cst_11 = arith.constant dense<0.000000e+00> : vector<32x128xf32>
    %10 = tpu.matmul %6, %9, %cst_11 {dimension_numbers = #tpu.dot_dimension_numbers<[1], [0], [0], [1], [0, 0, 1, 1], [], []>} : vector<32x128xf32>, vector<128x128xf32>, vector<32x128xf32> -> vector<32x128xf32>
    %c1_12 = arith.constant 1 : index
    %c0_13 = arith.constant 0 : index
    %c0_14 = arith.constant 0 : index
    %11 = vector.load %arg1[%c1_12, %c0_13, %c0_14] : memref<3x128x128xf32, #tpu.memory_space<vmem>>, vector<1x128x128xf32>
    %12 = vector.shape_cast %11 : vector<1x128x128xf32> to vector<128x128xf32>
    %cst_15 = arith.constant dense<0.000000e+00> : vector<32x128xf32>
    %13 = tpu.matmul %0, %12, %cst_15 {dimension_numbers = #tpu.dot_dimension_numbers<[1], [0], [0], [1], [0, 0, 1, 1], [], []>} : vector<32x128xf32>, vector<128x128xf32>, vector<32x128xf32> -> vector<32x128xf32>
    %14 = arith.addf %10, %13 : vector<32x128xf32>
    %c2 = arith.constant 2 : index
    %c0_16 = arith.constant 0 : index
    %c0_17 = arith.constant 0 : index
    %15 = vector.load %arg1[%c2, %c0_16, %c0_17] : memref<3x128x128xf32, #tpu.memory_space<vmem>>, vector<1x128x128xf32>
    %16 = vector.shape_cast %15 : vector<1x128x128xf32> to vector<128x128xf32>
    %cst_18 = arith.constant dense<0.000000e+00> : vector<32x128xf32>
    %17 = tpu.matmul %7, %16, %cst_18 {dimension_numbers = #tpu.dot_dimension_numbers<[1], [0], [0], [1], [0, 0, 1, 1], [], []>} : vector<32x128xf32>, vector<128x128xf32>, vector<32x128xf32> -> vector<32x128xf32>
    %18 = arith.addf %14, %17 : vector<32x128xf32>
    %c0_19 = arith.constant 0 : index
    %c0_20 = arith.constant 0 : index
    %19 = vector.load %arg4[%c0_19, %c0_20] : memref<128x128xf32, #tpu.memory_space<vmem>>, vector<128x128xf32>
    %cst_21 = arith.constant dense<0.000000e+00> : vector<1x128xf32>
    %20 = tpu.matmul %1, %18, %cst_21 {dimension_numbers = #tpu.dot_dimension_numbers<[1], [0], [0], [1], [0, 0, 1, 1], [], []>} : vector<1x32xf32>, vector<32x128xf32>, vector<1x128xf32> -> vector<1x128xf32>
    %cst_22 = arith.constant dense<0.000000e+00> : vector<1x128xf32>
    %21 = tpu.matmul %20, %19, %cst_22 {dimension_numbers = #tpu.dot_dimension_numbers<[1], [0], [0], [1], [0, 0, 1, 1], [], []>} : vector<1x128xf32>, vector<128x128xf32>, vector<1x128xf32> -> vector<1x128xf32>
    %cst_23 = arith.constant 0.001953125 : f32
    %22 = vector.broadcast %cst_23 : f32 to vector<1x128xf32>
    %23 = arith.mulf %21, %22 : vector<1x128xf32>
    %24 = vector.broadcast %23 : vector<1x128xf32> to vector<32x128xf32>
    %25 = arith.subf %18, %24 : vector<32x128xf32>
    %26 = arith.mulf %25, %25 : vector<32x128xf32>
    %cst_24 = arith.constant dense<0.000000e+00> : vector<1x128xf32>
    %27 = tpu.matmul %1, %26, %cst_24 {dimension_numbers = #tpu.dot_dimension_numbers<[1], [0], [0], [1], [0, 0, 1, 1], [], []>} : vector<1x32xf32>, vector<32x128xf32>, vector<1x128xf32> -> vector<1x128xf32>
    %cst_25 = arith.constant dense<0.000000e+00> : vector<1x128xf32>
    %28 = tpu.matmul %27, %19, %cst_25 {dimension_numbers = #tpu.dot_dimension_numbers<[1], [0], [0], [1], [0, 0, 1, 1], [], []>} : vector<1x128xf32>, vector<128x128xf32>, vector<1x128xf32> -> vector<1x128xf32>
    %cst_26 = arith.constant 0.001953125 : f32
    %29 = vector.broadcast %cst_26 : f32 to vector<1x128xf32>
    %30 = arith.mulf %28, %29 : vector<1x128xf32>
    %cst_27 = arith.constant 9.99999974E-6 : f32
    %31 = vector.broadcast %cst_27 : f32 to vector<1x128xf32>
    %32 = arith.addf %30, %31 : vector<1x128xf32>
    %33 = math.rsqrt %32 : vector<1x128xf32>
    %34 = vector.broadcast %33 : vector<1x128xf32> to vector<32x128xf32>
    %35 = arith.mulf %25, %34 : vector<32x128xf32>
    %c0_28 = arith.constant 0 : index
    %c0_29 = arith.constant 0 : index
    %36 = vector.load %arg5[%c0_28, %c0_29] : memref<1x128xf32, #tpu.memory_space<vmem>>, vector<1x128xf32>
    %37 = vector.broadcast %36 : vector<1x128xf32> to vector<32x128xf32>
    %38 = arith.mulf %35, %37 : vector<32x128xf32>
    %c0_30 = arith.constant 0 : index
    %c0_31 = arith.constant 0 : index
    %39 = vector.load %arg6[%c0_30, %c0_31] : memref<1x128xf32, #tpu.memory_space<vmem>>, vector<1x128xf32>
    %40 = vector.broadcast %39 : vector<1x128xf32> to vector<32x128xf32>
    %41 = arith.addf %38, %40 : vector<32x128xf32>
    %cst_32 = arith.constant 0.000000e+00 : f32
    %42 = vector.broadcast %cst_32 : f32 to vector<32x128xf32>
    %43 = arith.maximumf %41, %42 : vector<32x128xf32>
    %cst_33 = arith.constant dense<0.000000e+00> : vector<32x128xf32>
    %44 = tpu.matmul %3, %43, %cst_33 {dimension_numbers = #tpu.dot_dimension_numbers<[1], [0], [0], [1], [0, 0, 1, 1], [], []>} : vector<32x32xf32>, vector<32x128xf32>, vector<32x128xf32> -> vector<32x128xf32>
    %cst_34 = arith.constant dense<0.000000e+00> : vector<32x128xf32>
    %45 = tpu.matmul %5, %43, %cst_34 {dimension_numbers = #tpu.dot_dimension_numbers<[1], [0], [0], [1], [0, 0, 1, 1], [], []>} : vector<32x32xf32>, vector<32x128xf32>, vector<32x128xf32> -> vector<32x128xf32>
    %c0_35 = arith.constant 0 : index
    %c0_36 = arith.constant 0 : index
    %c0_37 = arith.constant 0 : index
    %46 = vector.load %arg2[%c0_35, %c0_36, %c0_37] : memref<3x128x128xf32, #tpu.memory_space<vmem>>, vector<1x128x128xf32>
    %47 = vector.shape_cast %46 : vector<1x128x128xf32> to vector<128x128xf32>
    %cst_38 = arith.constant dense<0.000000e+00> : vector<32x128xf32>
    %48 = tpu.matmul %44, %47, %cst_38 {dimension_numbers = #tpu.dot_dimension_numbers<[1], [0], [0], [1], [0, 0, 1, 1], [], []>} : vector<32x128xf32>, vector<128x128xf32>, vector<32x128xf32> -> vector<32x128xf32>
    %c1_39 = arith.constant 1 : index
    %c0_40 = arith.constant 0 : index
    %c0_41 = arith.constant 0 : index
    %49 = vector.load %arg2[%c1_39, %c0_40, %c0_41] : memref<3x128x128xf32, #tpu.memory_space<vmem>>, vector<1x128x128xf32>
    %50 = vector.shape_cast %49 : vector<1x128x128xf32> to vector<128x128xf32>
    %cst_42 = arith.constant dense<0.000000e+00> : vector<32x128xf32>
    %51 = tpu.matmul %43, %50, %cst_42 {dimension_numbers = #tpu.dot_dimension_numbers<[1], [0], [0], [1], [0, 0, 1, 1], [], []>} : vector<32x128xf32>, vector<128x128xf32>, vector<32x128xf32> -> vector<32x128xf32>
    %52 = arith.addf %48, %51 : vector<32x128xf32>
    %c2_43 = arith.constant 2 : index
    %c0_44 = arith.constant 0 : index
    %c0_45 = arith.constant 0 : index
    %53 = vector.load %arg2[%c2_43, %c0_44, %c0_45] : memref<3x128x128xf32, #tpu.memory_space<vmem>>, vector<1x128x128xf32>
    %54 = vector.shape_cast %53 : vector<1x128x128xf32> to vector<128x128xf32>
    %cst_46 = arith.constant dense<0.000000e+00> : vector<32x128xf32>
    %55 = tpu.matmul %45, %54, %cst_46 {dimension_numbers = #tpu.dot_dimension_numbers<[1], [0], [0], [1], [0, 0, 1, 1], [], []>} : vector<32x128xf32>, vector<128x128xf32>, vector<32x128xf32> -> vector<32x128xf32>
    %56 = arith.addf %52, %55 : vector<32x128xf32>
    %c0_47 = arith.constant 0 : index
    %c0_48 = arith.constant 0 : index
    %57 = vector.load %arg4[%c0_47, %c0_48] : memref<128x128xf32, #tpu.memory_space<vmem>>, vector<128x128xf32>
    %cst_49 = arith.constant dense<0.000000e+00> : vector<1x128xf32>
    %58 = tpu.matmul %1, %56, %cst_49 {dimension_numbers = #tpu.dot_dimension_numbers<[1], [0], [0], [1], [0, 0, 1, 1], [], []>} : vector<1x32xf32>, vector<32x128xf32>, vector<1x128xf32> -> vector<1x128xf32>
    %cst_50 = arith.constant dense<0.000000e+00> : vector<1x128xf32>
    %59 = tpu.matmul %58, %57, %cst_50 {dimension_numbers = #tpu.dot_dimension_numbers<[1], [0], [0], [1], [0, 0, 1, 1], [], []>} : vector<1x128xf32>, vector<128x128xf32>, vector<1x128xf32> -> vector<1x128xf32>
    %cst_51 = arith.constant 0.001953125 : f32
    %60 = vector.broadcast %cst_51 : f32 to vector<1x128xf32>
    %61 = arith.mulf %59, %60 : vector<1x128xf32>
    %62 = vector.broadcast %61 : vector<1x128xf32> to vector<32x128xf32>
    %63 = arith.subf %56, %62 : vector<32x128xf32>
    %64 = arith.mulf %63, %63 : vector<32x128xf32>
    %cst_52 = arith.constant dense<0.000000e+00> : vector<1x128xf32>
    %65 = tpu.matmul %1, %64, %cst_52 {dimension_numbers = #tpu.dot_dimension_numbers<[1], [0], [0], [1], [0, 0, 1, 1], [], []>} : vector<1x32xf32>, vector<32x128xf32>, vector<1x128xf32> -> vector<1x128xf32>
    %cst_53 = arith.constant dense<0.000000e+00> : vector<1x128xf32>
    %66 = tpu.matmul %65, %57, %cst_53 {dimension_numbers = #tpu.dot_dimension_numbers<[1], [0], [0], [1], [0, 0, 1, 1], [], []>} : vector<1x128xf32>, vector<128x128xf32>, vector<1x128xf32> -> vector<1x128xf32>
    %cst_54 = arith.constant 0.001953125 : f32
    %67 = vector.broadcast %cst_54 : f32 to vector<1x128xf32>
    %68 = arith.mulf %66, %67 : vector<1x128xf32>
    %cst_55 = arith.constant 9.99999974E-6 : f32
    %69 = vector.broadcast %cst_55 : f32 to vector<1x128xf32>
    %70 = arith.addf %68, %69 : vector<1x128xf32>
    %71 = math.rsqrt %70 : vector<1x128xf32>
    %72 = vector.broadcast %71 : vector<1x128xf32> to vector<32x128xf32>
    %73 = arith.mulf %63, %72 : vector<32x128xf32>
    %c0_56 = arith.constant 0 : index
    %c0_57 = arith.constant 0 : index
    %74 = vector.load %arg7[%c0_56, %c0_57] : memref<1x128xf32, #tpu.memory_space<vmem>>, vector<1x128xf32>
    %75 = vector.broadcast %74 : vector<1x128xf32> to vector<32x128xf32>
    %76 = arith.mulf %73, %75 : vector<32x128xf32>
    %c0_58 = arith.constant 0 : index
    %c0_59 = arith.constant 0 : index
    %77 = vector.load %arg8[%c0_58, %c0_59] : memref<1x128xf32, #tpu.memory_space<vmem>>, vector<1x128xf32>
    %78 = vector.broadcast %77 : vector<1x128xf32> to vector<32x128xf32>
    %79 = arith.addf %76, %78 : vector<32x128xf32>
    %80 = arith.addf %79, %0 : vector<32x128xf32>
    %cst_60 = arith.constant 0.000000e+00 : f32
    %81 = vector.broadcast %cst_60 : f32 to vector<32x128xf32>
    %82 = arith.maximumf %80, %81 : vector<32x128xf32>
    %c0_61 = arith.constant 0 : index
    %c0_62 = arith.constant 0 : index
    %83 = vector.load %arg9[%c0_61, %c0_62] : memref<32x128xf32, #tpu.memory_space<vmem>>, vector<32x128xf32>
    tpu.vector_store %arg9[%c0_61, %c0_62], %82 {strides = array<i32>} : memref<32x128xf32, #tpu.memory_space<vmem>>, vector<32x128xf32>,
    return
  }
}

</mosaic_0001>

<bundles_post_ra>
// kernel: tpu_custom_call.1
= control target key start
LH: loop header
LB: loop body
LE: loop exit
PB: predicated region body
PF: predicated region fallthrough
CT: control target
= control target key end

     0   :  { %14 = vsyncpa [#allocation3], 0  ;;  %s3128_s0 = inlined_call_operand.hbm [shape: f32[32,128], index: 0, kind: input, shape index: {}]   ;;  %s3129_s1 = inlined_call_operand.hbm [shape: f32[3,128,128], index: 1, kind: input, shape index: {}]   ;;  %s3130_s2 = inlined_call_operand.hbm [shape: f32[3,128,128], index: 2, kind: input, shape index: {}]   ;;  %s3131_s3 = inlined_call_operand.hbm [shape: f32[2,32,32], index: 3, kind: input, shape index: {}]   ;;  %s3132_s4 = inlined_call_operand.hbm [shape: f32[128,128], index: 4, kind: input, shape index: {}]   ;;  %s3133_s5 = inlined_call_operand.vmem [shape: f32[1,128], index: 5, kind: input, shape index: {}]   ;;  %s3134_s6 = inlined_call_operand.vmem [shape: f32[1,128], index: 6, kind: input, shape index: {}]   ;;  %s3135_s7 = inlined_call_operand.vmem [shape: f32[1,128], index: 7, kind: input, shape index: {}]   ;;  %s3136_s8 = inlined_call_operand.vmem [shape: f32[1,128], index: 8, kind: input, shape index: {}]   ;;  %s3137_s9 = inlined_call_operand.hbm [shape: f32[32,128], index: 9, kind: output, shape index: {}]  }
   0x1   :  { %15 = vsyncpa [#allocation6], 0 }
   0x2   :  { %16 = vsyncpa [#allocation9], 0 }
   0x3   :  { %17 = vsyncpa [#allocation4], 0  ;;  %s2682_s30 = smov [#allocation5]   ;;  %s2683_s11 = smov [#allocation8]  }
   0x4   :  { %s35_s10 = sshll.u32 %s2682_s30, 4  ;;  %s59_s12 = sshll.u32 %s2683_s11, 4  ;;  %s36_s10 = int_to_ptr.vmem [resolvable:$true] %s35_s10  ;;  %s60_s12 = int_to_ptr.vmem [resolvable:$true] %s59_s12 }
   0x5   :  { %s2562_s13 = scalar_lea.vmem %s36_s10, 6144  ;;  %p2567_p1 = scmp.lt.s32.totalorder %s36_s10, %s36_s10 }
   0x6   :  { %p2563_p0 = scmp.ne.s32.totalorder %s36_s10, %s2562_s13  ;;  %p2568_p2 = scmp.lt.s32.totalorder %s2562_s13, %s2562_s13 }
   0x8   :  { %p2569_p3 = por %p2568_p2, %p2567_p1 }
   0xa   :  { %p2570_p4 = pnand %p2569_p3, %p2563_p0 }
   0xc   :  { %2573 = shalt.err (!%p2570_p4)
}
   0xd   :  { %s2684_s14 = smov 128   ;;  %s2685_s15 = smov 8  }
   0xe   :  { %41 = dma.hbm_to_vmem [thread:$0]  %s3129_s1, 6144, %s36_s10, [#allocation6], %s2684_s14, %s2684_s14, %s2685_s15  }
   0xf   :  { %s2582_s18 = scalar_lea.vmem %s60_s12, 1024  ;;  %p2587_p6 = scmp.lt.s32.totalorder %s60_s12, %s60_s12 }
  0x10   :  { %p2583_p5 = scmp.ne.s32.totalorder %s60_s12, %s2582_s18  ;;  %p2588_p7 = scmp.lt.s32.totalorder %s2582_s18, %s2582_s18 }
  0x12   :  { %p2589_p8 = por %p2588_p7, %p2587_p6 }
  0x14   :  { %p2590_p9 = pnand %p2589_p8, %p2583_p5 }
  0x16   :  { %2593 = shalt.err (!%p2590_p9)
}
  0x17   :  { %65 = dma.hbm_to_vmem [thread:$0]  %s3131_s3, 1024, %s60_s12, [#allocation9], %s2684_s14, %s2684_s14, %s2685_s15  }
  0x18   :  { %s2686_s21 = smov [#allocation2]   ;;  %s2687_s23 = smov [#allocation7]  }
  0x19   :  { %s23_s22 = sshll.u32 %s2686_s21, 4  ;;  %s47_s24 = sshll.u32 %s2687_s23, 4  ;;  %s24_s22 = int_to_ptr.vmem [resolvable:$true] %s23_s22  ;;  %s48_s24 = int_to_ptr.vmem [resolvable:$true] %s47_s24 }
  0x1a   :  { %s2602_s1 = scalar_lea.vmem %s24_s22, 512  ;;  %p2607_p11 = scmp.lt.s32.totalorder %s24_s22, %s24_s22 }
  0x1b   :  { %p2603_p10 = scmp.ne.s32.totalorder %s24_s22, %s2602_s1  ;;  %p2608_p12 = scmp.lt.s32.totalorder %s2602_s1, %s2602_s1 }
  0x1d   :  { %p2609_p13 = por %p2608_p12, %p2607_p11 }
  0x1f   :  { %p2610_p0 = pnand %p2609_p13, %p2603_p10 }
  0x21   :  { %2613 = shalt.err (!%p2610_p0)
}
  0x22   :  { %29 = dma.hbm_to_vmem [thread:$0]  %s3128_s0, 512, %s24_s22, [#allocation3], %s2684_s14, %s2684_s14, %s2685_s15  }
  0x23   :  { %s2622_s3 = scalar_lea.vmem %s48_s24, 6144  ;;  %p2627_p2 = scmp.lt.s32.totalorder %s48_s24, %s48_s24 }
  0x24   :  { %p2623_p1 = scmp.ne.s32.totalorder %s48_s24, %s2622_s3  ;;  %p2628_p3 = scmp.lt.s32.totalorder %s2622_s3, %s2622_s3 }
  0x26   :  { %p2629_p4 = por %p2628_p3, %p2627_p2 }
  0x28   :  { %p2630_p5 = pnand %p2629_p4, %p2623_p1 }
  0x2a   :  { %2633 = shalt.err (!%p2630_p5)
}
  0x2b   :  { %53 = dma.hbm_to_vmem [thread:$0]  %s3130_s2, 6144, %s48_s24, [#allocation6], %s2684_s14, %s2684_s14, %s2685_s15  }
  0x2c   :  { %s2688_s29 = smov [#allocation10]  }
  0x2d   :  { %s71_s30 = sshll.u32 %s2688_s29, 4  ;;  %s72_s30 = int_to_ptr.vmem [resolvable:$true] %s71_s30 }
  0x2e   :  { %s2642_s10 = scalar_lea.vmem %s72_s30, 2048  ;;  %p2647_p7 = scmp.lt.s32.totalorder %s72_s30, %s72_s30 }
  0x2f   :  { %p2643_p6 = scmp.ne.s32.totalorder %s72_s30, %s2642_s10  ;;  %p2648_p8 = scmp.lt.s32.totalorder %s2642_s10, %s2642_s10 }
  0x31   :  { %p2649_p9 = por %p2648_p8, %p2647_p7 }
  0x33   :  { %p2650_p10 = pnand %p2649_p9, %p2643_p6 }
  0x35   :  { %2653 = shalt.err (!%p2650_p10)
}
  0x36   :  { %77 = dma.hbm_to_vmem [thread:$0]  %s3132_s4, 2048, %s72_s30, [#allocation9], %s2684_s14, %s2684_s14, %s2685_s15  }
  0x37   :  { %2674 = dma.done.wait [#allocation3], 512  }
  0x38   :  { %2675 = vsyncadd [#allocation3], 4294966784 }
  0x39   :  { %2676 = dma.done.wait [#allocation6], 12288  }
  0x3a   :  { %2677 = vsyncadd [#allocation6], 4294955008 }
  0x3b   :  { %2678 = dma.done.wait [#allocation9], 3072  }
  0x3c   :  { %2679 = vsyncadd [#allocation9], 4294964224  ;;  %vm114_vm0 = vcmask 261120   ;;  %v2773_v0 = vld [vmem:[#allocation2 + $0x18] sm:$0xff]  ;;  %v2775_v1 = vld [vmem:[#allocation2 + $0x10] sm:$0xff]  ;;  %vm2690_vm1 = vmmov 0  }
  0x3d   :  { %2067 = vmatprep.subr.mxu0 %v2773_v0  ;;  %v2778_v2 = vld [vmem:[#allocation8] sm:$0xff]  ;;  %v2781_v3 = vld [vmem:[#allocation2 + $0x8] sm:$0xff]  ;;  %v2791_v6 = vld [vmem:[#allocation8 + $0x10] sm:$0xff]  ;;  %s2692_s18 = smov [#allocation11]  }
  0x3e   :  { %2068 = vmatpush3.msra.mxu0 %v2773_v0  ;;  %2075 = vmatprep.mubr.msk.f32.mxu0 %vm114_vm0, %v2778_v2  ;;  %v101_v4 = vld [vmem:[#allocation2] sm:$0xff]  ;;  %v2789_v5 = vld [vmem:[#allocation8 + $0x8] sm:$0xff]  ;;  %v324_v7 = vld [vmem:[#allocation5 + $0x78] sm:$0xff]  ;;  %s1789_s19 = sshll.u32 %s2692_s18, 4  ;;  %s1790_s19 = int_to_ptr.vmem [resolvable:$true] %s1789_s19 }
  0x3f   :  { %2069 = vmatprep.subr.mxu0 %v2775_v1  ;;  %v2799_v8 = vld [vmem:[#allocation8 + $0x18] sm:$0xff]  ;;  %v2802_v9 = vld [vmem:[#allocation8 + $0x20] sm:$0xff]  ;;  %2133 = vmatprep.subr.mxu1 %v324_v7  ;;  %v323_v10 = vld [vmem:[#allocation5 + $0x70] sm:$0xff]  ;;  %p2659_p12 = scmp.lt.s32.totalorder %s1790_s19, %s1790_s19 }
  0x40   :  { %2070 = vmatpush3.msra.mxu0 %v2775_v1  ;;  %2134 = vmatpush3.msra.mxu1 %v324_v7  ;;  %v2811_v11 = vld [vmem:[#allocation8 + $0x28] sm:$0xff]  ;;  %v341_v12 = vld [vmem:[#allocation5 + $0xf8] sm:$0xff]  ;;  %v2813_v13 = vld [vmem:[#allocation8 + $0x30] sm:$0xff]  ;;  %v2689_v7 = vmov 0.0  }
  0x41   :  { %2071 = vmatprep.subr.mxu0 %v2781_v3  ;;  %2135 = vmatprep.subr.mxu1 %v323_v10  ;;  %v340_v14 = vld [vmem:[#allocation5 + $0xf0] sm:$0xff]  ;;  %v322_v15 = vld [vmem:[#allocation5 + $0x68] sm:$0xff]  ;;  %v2819_v16 = vld [vmem:[#allocation8 + $0x38] sm:$0xff] }
  0x42   :  { %2072 = vmatpush3.msra.mxu0 %v2781_v3  ;;  %2136 = vmatpush3.msra.mxu1 %v323_v10  ;;  %v339_v17 = vld [vmem:[#allocation5 + $0xe8] sm:$0xff]  ;;  %v338_v18 = vld [vmem:[#allocation5 + $0xe0] sm:$0xff]  ;;  %v337_v20 = vld [vmem:[#allocation5 + $0xd8] sm:$0xff] }
  0x43   :  { %2073 = vmatprep.subr.mxu0 %v101_v4  ;;  %2137 = vmatprep.subr.mxu1 %v322_v15  ;;  %v321_v19 = vld [vmem:[#allocation5 + $0x60] sm:$0xff]  ;;  %v320_v21 = vld [vmem:[#allocation5 + $0x58] sm:$0xff]  ;;  %v336_v22 = vld [vmem:[#allocation5 + $0xd0] sm:$0xff] }
  0x44   :  { %2074 = vmatpush3.msra.mxu0 %v101_v4  ;;  %2138 = vmatpush3.msra.mxu1 %v322_v15  ;;  %v319_v23 = vld [vmem:[#allocation5 + $0x50] sm:$0xff]  ;;  %v335_v24 = vld [vmem:[#allocation5 + $0xc8] sm:$0xff]  ;;  %v334_v26 = vld [vmem:[#allocation5 + $0xc0] sm:$0xff] }
  0x45   :  { %2076 = vmatmul.mubr.msk.f32.vlgmr.msra.gmra.mxu0 %vm114_vm0, %v2789_v5  ;;  %2081 = vmatprep.subr.mxu0 %v2773_v0  ;;  %v318_v25 = vld [vmem:[#allocation5 + $0x48] sm:$0xff]  ;;  %v317_v27 = vld [vmem:[#allocation5 + $0x40] sm:$0xff]  ;;  %v333_v28 = vld [vmem:[#allocation5 + $0xb8] sm:$0xff] }
  0x46   :  { %2082 = vmatpush3.msra.mxu0 %v2773_v0  ;;  %2078 = vmatprep.mubr.msk.f32.mxu0 %vm114_vm0, %v2791_v6  ;;  %v316_v29 = vld [vmem:[#allocation5 + $0x38] sm:$0xff]  ;;  %v332_v30 = vld [vmem:[#allocation5 + $0xb0] sm:$0xff]  ;;  %v331_v32 = vld [vmem:[#allocation5 + $0xa8] sm:$0xff] }
  0x47   :  { %2083 = vmatprep.subr.mxu0 %v2775_v1  ;;  %2139 = vmatprep.subr.mxu1 %v321_v19  ;;  %v315_v31 = vld [vmem:[#allocation5 + $0x30] sm:$0xff]  ;;  %v314_v33 = vld [vmem:[#allocation5 + $0x28] sm:$0xff]  ;;  %v330_v34 = vld [vmem:[#allocation5 + $0xa0] sm:$0xff] }
  0x48   :  { %2084 = vmatpush3.msra.mxu0 %v2775_v1  ;;  %2140 = vmatpush3.msra.mxu1 %v321_v19  ;;  %v313_v35 = vld [vmem:[#allocation5 + $0x20] sm:$0xff]  ;;  %v329_v36 = vld [vmem:[#allocation5 + $0x98] sm:$0xff]  ;;  %v328_v38 = vld [vmem:[#allocation5 + $0x90] sm:$0xff] }
  0x49   :  { %2079 = vmatmul.mubr.msk.f32.gmra.mxu0 %vm114_vm0, %v2799_v8  ;;  %2085 = vmatprep.subr.mxu0 %v2781_v3  ;;  %v312_v37 = vld [vmem:[#allocation5 + $0x18] sm:$0xff]  ;;  %v311_v39 = vld [vmem:[#allocation5 + $0x10] sm:$0xff]  ;;  %v327_v40 = vld [vmem:[#allocation5 + $0x88] sm:$0xff] }
  0x4a   :  { %2086 = vmatpush3.msra.mxu0 %v2781_v3  ;;  %2089 = vmatprep.mubr.msk.f32.mxu0 %vm114_vm0, %v2802_v9  ;;  %v326_v41 = vld [vmem:[#allocation5 + $0x80] sm:$0xff]  ;;  %v528_v42 = vld [vmem:[#allocation5 + $0x178] sm:$0xff]  ;;  %v527_v43 = vld [vmem:[#allocation5 + $0x170] sm:$0xff] }
  0x4b   :  { %2087 = vmatprep.subr.mxu0 %v101_v4  ;;  %2141 = vmatprep.subr.mxu1 %v320_v21  ;;  %v526_v44 = vld [vmem:[#allocation5 + $0x168] sm:$0xff]  ;;  %v525_v45 = vld [vmem:[#allocation5 + $0x160] sm:$0xff]  ;;  %v524_v46 = vld [vmem:[#allocation5 + $0x158] sm:$0xff] }
  0x4c   :  { %2088 = vmatpush3.msra.mxu0 %v101_v4  ;;  %2142 = vmatpush3.msra.mxu1 %v320_v21  ;;  %v523_v47 = vld [vmem:[#allocation5 + $0x150] sm:$0xff]  ;;  %v522_v48 = vld [vmem:[#allocation5 + $0x148] sm:$0xff]  ;;  %v521_v49 = vld [vmem:[#allocation5 + $0x140] sm:$0xff] }
  0x4d   :  { %2090 = vmatmul.mubr.msk.f32.vlgmr.msra.gmra.mxu0 %vm114_vm0, %v2811_v11  ;;  %2095 = vmatprep.subr.mxu0 %v341_v12  ;;  %v520_v50 = vld [vmem:[#allocation5 + $0x138] sm:$0xff]  ;;  %v519_v51 = vld [vmem:[#allocation5 + $0x130] sm:$0xff]  ;;  %v310_v52 = vld [vmem:[#allocation5 + $0x8] sm:$0xff] }
  0x4e   :  { %2092 = vmatprep.mubr.msk.f32.mxu0 %vm114_vm0, %v2813_v13  ;;  %2096 = vmatpush3.msra.mxu0 %v341_v12  ;;  %v518_v53 = vld [vmem:[#allocation5 + $0x128] sm:$0xff]  ;;  %v309_v54 = vld [vmem:[#allocation5] sm:$0xff]  ;;  %v516_v56 = vld [vmem:[#allocation5 + $0x118] sm:$0xff] }
  0x4f   :  { %2097 = vmatprep.subr.mxu0 %v340_v14  ;;  %2143 = vmatprep.subr.mxu1 %v319_v23  ;;  %v517_v55 = vld [vmem:[#allocation5 + $0x120] sm:$0xff]  ;;  %v515_v57 = vld [vmem:[#allocation5 + $0x110] sm:$0xff]  ;;  %v514_v58 = vld [vmem:[#allocation5 + $0x108] sm:$0xff] }
  0x50   :  { %2098 = vmatpush3.msra.mxu0 %v340_v14  ;;  %2144 = vmatpush3.msra.mxu1 %v319_v23  ;;  %v513_v59 = vld [vmem:[#allocation5 + $0x100] sm:$0xff] }
  0x51   :  { %2093 = vmatmul.mubr.msk.f32.gmra.mxu0 %vm114_vm0, %v2819_v16  ;;  %2099 = vmatprep.subr.mxu0 %v339_v17 }
  0x52   :  { %2100 = vmatpush3.msra.mxu0 %v339_v17  ;;  %2127 = vmatprep.mubr.f32.mxu0 %v101_v4 }
  0x53   :  { %2101 = vmatprep.subr.mxu0 %v338_v18  ;;  %2145 = vmatprep.subr.mxu1 %v318_v25 }
  0x54   :  { %2102 = vmatpush3.msra.mxu0 %v338_v18  ;;  %2146 = vmatpush3.msra.mxu1 %v318_v25 }
  0x55   :  { %2103 = vmatprep.subr.mxu0 %v337_v20  ;;  %2147 = vmatprep.subr.mxu1 %v317_v27 }
  0x56   :  { %2104 = vmatpush3.msra.mxu0 %v337_v20  ;;  %2148 = vmatpush3.msra.mxu1 %v317_v27 }
  0x57   :  { %2105 = vmatprep.subr.mxu0 %v336_v22  ;;  %2149 = vmatprep.subr.mxu1 %v316_v29 }
  0x58   :  { %2106 = vmatpush3.msra.mxu0 %v336_v22  ;;  %2150 = vmatpush3.msra.mxu1 %v316_v29 }
  0x59   :  { %2107 = vmatprep.subr.mxu0 %v335_v24  ;;  %2151 = vmatprep.subr.mxu1 %v315_v31 }
  0x5a   :  { %2108 = vmatpush3.msra.mxu0 %v335_v24  ;;  %2152 = vmatpush3.msra.mxu1 %v315_v31 }
  0x5b   :  { %2109 = vmatprep.subr.mxu0 %v334_v26  ;;  %2153 = vmatprep.subr.mxu1 %v314_v33 }
  0x5c   :  { %2110 = vmatpush3.msra.mxu0 %v334_v26  ;;  %2154 = vmatpush3.msra.mxu1 %v314_v33  ;;  %v2846_v33 = vld [vmem:[#allocation10 + $0x78] sm:$0xff] }
  0x5d   :  { %2111 = vmatprep.subr.mxu0 %v333_v28  ;;  %2155 = vmatprep.subr.mxu1 %v313_v35 }
  0x5e   :  { %2112 = vmatpush3.msra.mxu0 %v333_v28  ;;  %2156 = vmatpush3.msra.mxu1 %v313_v35  ;;  %v2852_v35 = vld [vmem:[#allocation10 + $0x70] sm:$0xff] }
  0x5f   :  { %2113 = vmatprep.subr.mxu0 %v332_v30  ;;  %2157 = vmatprep.subr.mxu1 %v312_v37 }
  0x60   :  { %2114 = vmatpush3.msra.mxu0 %v332_v30  ;;  %2158 = vmatpush3.msra.mxu1 %v312_v37  ;;  %v2862_v37 = vld [vmem:[#allocation10 + $0x60] sm:$0xff] }
  0x61   :  { %2115 = vmatprep.subr.mxu0 %v331_v32  ;;  %2159 = vmatprep.subr.mxu1 %v311_v39 }
  0x62   :  { %2116 = vmatpush3.msra.mxu0 %v331_v32  ;;  %2160 = vmatpush3.msra.mxu1 %v311_v39  ;;  %v2870_v39 = vld [vmem:[#allocation10 + $0x50] sm:$0xff] }
  0x63   :  { %2117 = vmatprep.subr.mxu0 %v330_v34  ;;  %2161 = vmatprep.subr.mxu1 %v310_v52 }
  0x64   :  { %2118 = vmatpush3.msra.mxu0 %v330_v34  ;;  %2162 = vmatpush3.msra.mxu1 %v310_v52  ;;  %v2691_v34 = vmov 1.0   ;;  %v778_v52 = vlaneseq }
  0x65   :  { %2119 = vmatprep.subr.mxu0 %v329_v36  ;;  %2163 = vmatprep.subr.mxu1 %v309_v54 }
  0x66   :  { %2120 = vmatpush3.msra.mxu0 %v329_v36  ;;  %2164 = vmatpush3.msra.mxu1 %v309_v54  ;;  %v2858_v36 = vld [vmem:[#allocation10 + $0x68] sm:$0xff] }
  0x67   :  { %2121 = vmatprep.subr.mxu0 %v328_v38  ;;  %2209 = vmatprep.subr.mxu1 %v2689_v7 }
  0x68   :  { %2122 = vmatpush3.msra.mxu0 %v328_v38  ;;  %v2866_v38 = vld [vmem:[#allocation10 + $0x58] sm:$0xff] }
  0x69   :  { %2123 = vmatprep.subr.mxu0 %v327_v40 }
  0x6a   :  { %2124 = vmatpush3.msra.mxu0 %v327_v40  ;;  %v2874_v40 = vld [vmem:[#allocation10 + $0x48] sm:$0xff] }
  0x6b   :  { %2125 = vmatprep.subr.mxu0 %v326_v41 }
  0x6c   :  { %2126 = vmatpush3.msra.mxu0 %v326_v41  ;;  %v2878_v41 = vld [vmem:[#allocation10 + $0x40] sm:$0xff] }
  0x6d   :  { %2128 = vmatmul.mubr.f32.vlgmr.msra.gmra.mxu0 %v2781_v3  ;;  %2171 = vmatprep.subr.mxu0 %v528_v42 }
  0x6e   :  { %2172 = vmatpush3.msra.mxu0 %v528_v42  ;;  %2130 = vmatprep.mubr.f32.mxu0 %v2775_v1  ;;  %v2882_v42 = vld [vmem:[#allocation10 + $0x38] sm:$0xff] }
  0x6f   :  { %2173 = vmatprep.subr.mxu0 %v527_v43 }
  0x70   :  { %2174 = vmatpush3.msra.mxu0 %v527_v43  ;;  %v2886_v43 = vld [vmem:[#allocation10 + $0x30] sm:$0xff] }
  0x71   :  { %2175 = vmatprep.subr.mxu0 %v526_v44  ;;  %2131 = vmatmul.mubr.f32.gmra.mxu0 %v2773_v0 }
  0x72   :  { %2176 = vmatpush3.msra.mxu0 %v526_v44  ;;  %v2890_v44 = vld [vmem:[#allocation10 + $0x28] sm:$0xff] }
  0x73   :  { %2177 = vmatprep.subr.mxu0 %v525_v45 }
  0x74   :  { %2178 = vmatpush3.msra.mxu0 %v525_v45  ;;  %v2894_v45 = vld [vmem:[#allocation10 + $0x20] sm:$0xff] }
  0x75   :  { %2179 = vmatprep.subr.mxu0 %v524_v46 }
  0x76   :  { %2180 = vmatpush3.msra.mxu0 %v524_v46  ;;  %v2898_v46 = vld [vmem:[#allocation10 + $0x18] sm:$0xff] }
  0x77   :  { %2181 = vmatprep.subr.mxu0 %v523_v47 }
  0x78   :  { %2182 = vmatpush3.msra.mxu0 %v523_v47  ;;  %v2902_v47 = vld [vmem:[#allocation10 + $0x10] sm:$0xff] }
  0x79   :  { %2183 = vmatprep.subr.mxu0 %v522_v48 }
  0x7a   :  { %2184 = vmatpush3.msra.mxu0 %v522_v48  ;;  %v2906_v48 = vld [vmem:[#allocation10 + $0x8] sm:$0xff] }
  0x7b   :  { %2185 = vmatprep.subr.mxu0 %v521_v49 }
  0x7c   :  { %2186 = vmatpush3.msra.mxu0 %v521_v49  ;;  %v2912_v49 = vld [vmem:[#allocation10] sm:$0xff] }
  0x7d   :  { %2187 = vmatprep.subr.mxu0 %v520_v50 }
  0x7e   :  { %2188 = vmatpush3.msra.mxu0 %v520_v50 }
  0x7f   :  { %2189 = vmatprep.subr.mxu0 %v519_v51 }
  0x80   :  { %2190 = vmatpush3.msra.mxu0 %v519_v51 }
  0x81   :  { %2191 = vmatprep.subr.mxu0 %v518_v53 }
  0x82   :  { %2192 = vmatpush3.msra.mxu0 %v518_v53  ;;  %v779_v53 = vshrl.u32 %v778_v52, 7 }
  0x83   :  { %2193 = vmatprep.subr.mxu0 %v517_v55 }
  0x84   :  { %2194 = vmatpush3.msra.mxu0 %v517_v55  ;;  %v2917_v54 = vsub.s32 0, %v779_v53 }
  0x85   :  { %2195 = vmatprep.subr.mxu0 %v516_v56 }
  0x86   :  { %2196 = vmatpush3.msra.mxu0 %v516_v56 }
  0x87   :  { %2197 = vmatprep.subr.mxu0 %v515_v57 }
  0x88   :  { %2198 = vmatpush3.msra.mxu0 %v515_v57 }
  0x89   :  { %2199 = vmatprep.subr.mxu0 %v514_v58 }
  0x8a   :  { %2200 = vmatpush3.msra.mxu0 %v514_v58 }
  0x8b   :  { %2201 = vmatprep.subr.mxu0 %v513_v59 }
  0x8c   :  { %2202 = vmatpush3.msra.mxu0 %v513_v59 }
  0x8d   :  { %2255 = vmatprep.subr.mxu0 %v2689_v7 }
 0x105   :  { %v2077_v60 = vpop.f32.mrf.mxu0 }
 0x107   :  { %v193_v61 = vpop.f32.mrf.mxu0 }
 0x108   :  { %2165 = vmatprep.mubr.f32.mxu1 %v193_v61 }
 0x109   :  { %v2080_v62 = vpop.f32.mrf.mxu0  ;;  %2166 = vmatmul.mubr.f32.vlgmr.msra.gmra.mxu1 %v2077_v60 }
 0x10b   :  { %v203_v63 = vpop.f32.mrf.mxu0 }
 0x10c   :  { %2168 = vmatprep.mubr.f32.mxu1 %v203_v63 }
 0x10d   :  { %v2091_v0 = vpop.f32.mrf.mxu0  ;;  %2169 = vmatmul.mubr.f32.gmra.mxu1 %v2080_v62 }
 0x10e   :  { %2217 = vmatprep.mubr.msk.f32.mxu1 %vm2690_vm1, %v2689_v7 }
 0x10f   :  { %v290_v1 = vpop.f32.mrf.mxu0 }
 0x110   :  { %2203 = vmatprep.mubr.f32.mxu0 %v290_v1 }
 0x111   :  { %v2094_v3 = vpop.f32.mrf.mxu0  ;;  %2204 = vmatmul.mubr.f32.vlgmr.msra.gmra.mxu0 %v2091_v0 }
 0x113   :  { %v300_v4 = vpop.f32.mrf.mxu0 }
 0x114   :  { %2206 = vmatprep.mubr.f32.mxu0 %v300_v4 }
 0x115   :  { %2207 = vmatmul.mubr.f32.gmra.mxu0 %v2094_v3 }
 0x116   :  { %2263 = vmatprep.mubr.msk.f32.mxu0 %vm2690_vm1, %v2689_v7 }
 0x12d   :  { %v2129_v10 = vpop.f32.mrf.mxu0 }
 0x12f   :  { %v408_v12 = vpop.f32.mrf.mxu0 }
 0x131   :  { %v2132_v15 = vpop.f32.mrf.mxu0 }
 0x133   :  { %v418_v18 = vpop.f32.mrf.mxu0 }
 0x1c9   :  { %v2167_v14 = vpop.f32.mrf.mxu1 }
 0x1ca   :  { %v499_v28 = vadd.f32 %v2167_v14, %v2129_v10  ;;  %v1152_v10 = vld [vmem:[#allocation7 + $0x78] sm:$0xff]  ;;  %v1150_v14 = vld [vmem:[#allocation7 + $0x68] sm:$0xff] }
 0x1cb   :  { %v493_v17 = vpop.f32.mrf.mxu1 }
 0x1cc   :  { %v494_v30 = vadd.f32 %v493_v17, %v408_v12  ;;  %v1151_v12 = vld [vmem:[#allocation7 + $0x70] sm:$0xff]  ;;  %v1148_v17 = vld [vmem:[#allocation7 + $0x58] sm:$0xff] }
 0x1cd   :  { %v2170_v19 = vpop.f32.mrf.mxu1 }
 0x1ce   :  { %v509_v23 = vadd.f32 %v2170_v19, %v2132_v15  ;;  %v1149_v15 = vld [vmem:[#allocation7 + $0x60] sm:$0xff]  ;;  %v1146_v19 = vld [vmem:[#allocation7 + $0x48] sm:$0xff] }
 0x1cf   :  { %v503_v21 = vpop.f32.mrf.mxu1 }
 0x1d0   :  { %v504_v25 = vadd.f32 %v503_v21, %v418_v18  ;;  %v1147_v18 = vld [vmem:[#allocation7 + $0x50] sm:$0xff]  ;;  %v1144_v21 = vld [vmem:[#allocation7 + $0x38] sm:$0xff] }
 0x1d1   :  { %v2205_v20 = vpop.f32.mrf.mxu0 }
 0x1d2   :  { %v2838_v31 = vadd.f32 %v2205_v20, %v499_v28  ;;  %v1145_v20 = vld [vmem:[#allocation7 + $0x40] sm:$0xff] }
 0x1d3   :  { %v595_v22 = vpop.f32.mrf.mxu0 }
 0x1d4   :  { %v2842_v32 = vadd.f32 %v595_v22, %v494_v30  ;;  %v1143_v22 = vld [vmem:[#allocation7 + $0x30] sm:$0xff] }
 0x1d5   :  { %v2208_v24 = vpop.f32.mrf.mxu0 }
 0x1d6   :  { %v2832_v26 = vadd.f32 %v2208_v24, %v509_v23  ;;  %v1142_v23 = vld [vmem:[#allocation7 + $0x28] sm:$0xff]  ;;  %v1141_v24 = vld [vmem:[#allocation7 + $0x20] sm:$0xff] }
 0x1d7   :  { %v605_v27 = vpop.f32.mrf.mxu0 }
 0x1d8   :  { %v2834_v29 = vadd.f32 %v605_v27, %v504_v25  ;;  %2210 = vmatpush3.msra.mxu1 %v2832_v26  ;;  %v1140_v25 = vld [vmem:[#allocation7 + $0x18] sm:$0xff] }
 0x1d9   :  { %2211 = vmatprep.subr.mxu1 %v2689_v7 }
 0x1da   :  { %2212 = vmatpush3.msra.mxu1 %v2834_v29 }
 0x1db   :  { %2213 = vmatprep.subr.mxu1 %v2689_v7 }
 0x1dc   :  { %2214 = vmatpush3.msra.mxu1 %v2838_v31 }
 0x1dd   :  { %2215 = vmatprep.subr.mxu1 %v2689_v7 }
 0x1de   :  { %2216 = vmatpush3.msra.mxu1 %v2842_v32 }
 0x1df   :  { %2218 = vmatmul.mubr.msk.f32.vlgmr.msra.gmra.mxu1 %vm114_vm0, %v2691_v34  ;;  %2220 = vmatprep.subr.mxu1 %v2689_v7 }
 0x1e0   :  { %2221 = vmatpush3.msra.mxu1 %v2846_v33  ;;  %2252 = vmatprep.mubr.msk.f32.mxu1 %vm2690_vm1, %v2689_v7 }
 0x1e1   :  { %2222 = vmatprep.subr.mxu1 %v2689_v7 }
 0x1e2   :  { %2223 = vmatpush3.msra.mxu1 %v2852_v35 }
 0x1e3   :  { %2224 = vmatprep.subr.mxu1 %v2689_v7 }
 0x1e4   :  { %2225 = vmatpush3.msra.mxu1 %v2858_v36 }
 0x1e5   :  { %2226 = vmatprep.subr.mxu1 %v2689_v7 }
 0x1e6   :  { %2227 = vmatpush3.msra.mxu1 %v2862_v37 }
 0x1e7   :  { %2228 = vmatprep.subr.mxu1 %v2689_v7 }
 0x1e8   :  { %2229 = vmatpush3.msra.mxu1 %v2866_v38 }
 0x1e9   :  { %2230 = vmatprep.subr.mxu1 %v2689_v7 }
 0x1ea   :  { %2231 = vmatpush3.msra.mxu1 %v2870_v39 }
 0x1eb   :  { %2232 = vmatprep.subr.mxu1 %v2689_v7 }
 0x1ec   :  { %2233 = vmatpush3.msra.mxu1 %v2874_v40 }
 0x1ed   :  { %2234 = vmatprep.subr.mxu1 %v2689_v7 }
 0x1ee   :  { %2235 = vmatpush3.msra.mxu1 %v2878_v41 }
 0x1ef   :  { %2236 = vmatprep.subr.mxu1 %v2689_v7 }
 0x1f0   :  { %2237 = vmatpush3.msra.mxu1 %v2882_v42 }
 0x1f1   :  { %2238 = vmatprep.subr.mxu1 %v2689_v7 }
 0x1f2   :  { %2239 = vmatpush3.msra.mxu1 %v2886_v43 }
 0x1f3   :  { %2240 = vmatprep.subr.mxu1 %v2689_v7 }
 0x1f4   :  { %2241 = vmatpush3.msra.mxu1 %v2890_v44 }
 0x1f5   :  { %2242 = vmatprep.subr.mxu1 %v2689_v7 }
 0x1f6   :  { %2243 = vmatpush3.msra.mxu1 %v2894_v45 }
 0x1f7   :  { %2244 = vmatprep.subr.mxu1 %v2689_v7 }
 0x1f8   :  { %2245 = vmatpush3.msra.mxu1 %v2898_v46 }
 0x1f9   :  { %2246 = vmatprep.subr.mxu1 %v2689_v7 }
 0x1fa   :  { %2247 = vmatpush3.msra.mxu1 %v2902_v47 }
 0x1fb   :  { %2248 = vmatprep.subr.mxu1 %v2689_v7 }
 0x1fc   :  { %2249 = vmatpush3.msra.mxu1 %v2906_v48 }
 0x1fd   :  { %2250 = vmatprep.subr.mxu1 %v2689_v7 }
 0x1fe   :  { %2251 = vmatpush3.msra.mxu1 %v2912_v49 }
 0x29f   :  { %v703_v50 = vpop.f32.mrf.mxu1 }
 0x2a0   :  { %2253 = vmatmul.mubr.f32.vlgmr.msra.gmra.mxu1 %v703_v50  ;;  %v1813_v50 = vld [vmem:[%s3133_s5] ss:$0 sm:$0xff] }
 0x2a1   :  { %v2219_v51 = vpop.f32.mrf.mxu1  ;;  %2309 = vmatprep.mubr.msk.f32.mxu1 %vm114_vm0, %v2778_v2 }
 0x360   :  { %v773_v55 = vpop.f32.mrf.mxu1 }
 0x361   :  { %v777_v56 = vmul.f32 0.001953125, %v773_v55 }
 0x362   :  { %v2254_v57 = vpop.f32.mrf.mxu1 }
 0x363   :  { %v781_v58 = vrot.slane %v777_v56, %v2917_v54  ;;  %v1814_v56 = vld [vmem:[%s3134_s6] ss:$0 sm:$0xff] }
 0x365   :  { %v2921_v59 = vsub.f32 %v2832_v26, %v781_v58  ;;  %v2924_v60 = vsub.f32 %v2834_v29, %v781_v58  ;;  %v2929_v2 = vsub.f32 %v2838_v31, %v781_v58  ;;  %v2934_v63 = vsub.f32 %v2842_v32, %v781_v58  ;;  %v1139_v26 = vld [vmem:[#allocation7 + $0x10] sm:$0xff] }
 0x367   :  { %v789_v61 = vmul.f32 %v2921_v59, %v2921_v59  ;;  %v788_v62 = vmul.f32 %v2924_v60, %v2924_v60  ;;  %v787_v0 = vmul.f32 %v2929_v2, %v2929_v2  ;;  %v786_v1 = vmul.f32 %v2934_v63, %v2934_v63 }
 0x369   :  { %2256 = vmatpush3.msra.mxu0 %v789_v61 }
 0x36a   :  { %2257 = vmatprep.subr.mxu0 %v2689_v7 }
 0x36b   :  { %2258 = vmatpush3.msra.mxu0 %v788_v62 }
 0x36c   :  { %2259 = vmatprep.subr.mxu0 %v2689_v7 }
 0x36d   :  { %2260 = vmatpush3.msra.mxu0 %v787_v0 }
 0x36e   :  { %2261 = vmatprep.subr.mxu0 %v2689_v7 }
 0x36f   :  { %2262 = vmatpush3.msra.mxu0 %v786_v1 }
 0x370   :  { %2264 = vmatmul.mubr.msk.f32.vlgmr.msra.gmra.mxu0 %vm114_vm0, %v2691_v34  ;;  %2266 = vmatprep.subr.mxu0 %v2689_v7 }
 0x371   :  { %2267 = vmatpush3.msra.mxu0 %v2846_v33  ;;  %2298 = vmatprep.mubr.msk.f32.mxu0 %vm2690_vm1, %v2689_v7 }
 0x372   :  { %2268 = vmatprep.subr.mxu0 %v2689_v7 }
 0x373   :  { %2269 = vmatpush3.msra.mxu0 %v2852_v35 }
 0x374   :  { %2270 = vmatprep.subr.mxu0 %v2689_v7 }
 0x375   :  { %2271 = vmatpush3.msra.mxu0 %v2858_v36 }
 0x376   :  { %2272 = vmatprep.subr.mxu0 %v2689_v7 }
 0x377   :  { %2273 = vmatpush3.msra.mxu0 %v2862_v37 }
 0x378   :  { %2274 = vmatprep.subr.mxu0 %v2689_v7 }
 0x379   :  { %2275 = vmatpush3.msra.mxu0 %v2866_v38 }
 0x37a   :  { %2276 = vmatprep.subr.mxu0 %v2689_v7 }
 0x37b   :  { %2277 = vmatpush3.msra.mxu0 %v2870_v39 }
 0x37c   :  { %2278 = vmatprep.subr.mxu0 %v2689_v7 }
 0x37d   :  { %2279 = vmatpush3.msra.mxu0 %v2874_v40 }
 0x37e   :  { %2280 = vmatprep.subr.mxu0 %v2689_v7 }
 0x37f   :  { %2281 = vmatpush3.msra.mxu0 %v2878_v41 }
 0x380   :  { %2282 = vmatprep.subr.mxu0 %v2689_v7 }
 0x381   :  { %2283 = vmatpush3.msra.mxu0 %v2882_v42 }
 0x382   :  { %2284 = vmatprep.subr.mxu0 %v2689_v7 }
 0x383   :  { %2285 = vmatpush3.msra.mxu0 %v2886_v43 }
 0x384   :  { %2286 = vmatprep.subr.mxu0 %v2689_v7 }
 0x385   :  { %2287 = vmatpush3.msra.mxu0 %v2890_v44 }
 0x386   :  { %2288 = vmatprep.subr.mxu0 %v2689_v7 }
 0x387   :  { %2289 = vmatpush3.msra.mxu0 %v2894_v45 }
 0x388   :  { %2290 = vmatprep.subr.mxu0 %v2689_v7 }
 0x389   :  { %2291 = vmatpush3.msra.mxu0 %v2898_v46 }
 0x38a   :  { %2292 = vmatprep.subr.mxu0 %v2689_v7 }
 0x38b   :  { %2293 = vmatpush3.msra.mxu0 %v2902_v47 }
 0x38c   :  { %2294 = vmatprep.subr.mxu0 %v2689_v7 }
 0x38d   :  { %2295 = vmatpush3.msra.mxu0 %v2906_v48 }
 0x38e   :  { %2296 = vmatprep.subr.mxu0 %v2689_v7 }
 0x38f   :  { %2297 = vmatpush3.msra.mxu0 %v2912_v49 }
 0x390   :  { %2367 = vmatprep.subr.mxu0 %v1152_v10 }
 0x430   :  { %v856_v3 = vpop.f32.mrf.mxu0 }
 0x431   :  { %2299 = vmatmul.mubr.f32.vlgmr.msra.gmra.mxu0 %v856_v3 }
 0x432   :  { %v2265_v4 = vpop.f32.mrf.mxu0  ;;  %2368 = vmatpush3.msra.mxu0 %v1152_v10  ;;  %v1168_v10 = vld [vmem:[#allocation7 + $0xf0] sm:$0xff] }
 0x433   :  { %2369 = vmatprep.subr.mxu0 %v1151_v12 }
 0x434   :  { %2370 = vmatpush3.msra.mxu0 %v1151_v12  ;;  %v1164_v12 = vld [vmem:[#allocation7 + $0xd0] sm:$0xff] }
 0x435   :  { %2371 = vmatprep.subr.mxu0 %v1150_v14 }
 0x436   :  { %2372 = vmatpush3.msra.mxu0 %v1150_v14  ;;  %v1161_v14 = vld [vmem:[#allocation7 + $0xb8] sm:$0xff] }
 0x437   :  { %2373 = vmatprep.subr.mxu0 %v1149_v15 }
 0x438   :  { %2374 = vmatpush3.msra.mxu0 %v1149_v15  ;;  %v1160_v15 = vld [vmem:[#allocation7 + $0xb0] sm:$0xff] }
 0x439   :  { %2375 = vmatprep.subr.mxu0 %v1148_v17 }
 0x43a   :  { %2376 = vmatpush3.msra.mxu0 %v1148_v17  ;;  %v1158_v17 = vld [vmem:[#allocation7 + $0xa0] sm:$0xff] }
 0x43b   :  { %2377 = vmatprep.subr.mxu0 %v1147_v18 }
 0x43c   :  { %2378 = vmatpush3.msra.mxu0 %v1147_v18  ;;  %v1157_v18 = vld [vmem:[#allocation7 + $0x98] sm:$0xff] }
 0x43d   :  { %2379 = vmatprep.subr.mxu0 %v1146_v19 }
 0x43e   :  { %2380 = vmatpush3.msra.mxu0 %v1146_v19  ;;  %v1156_v19 = vld [vmem:[#allocation7 + $0x90] sm:$0xff] }
 0x43f   :  { %2381 = vmatprep.subr.mxu0 %v1145_v20 }
 0x440   :  { %2382 = vmatpush3.msra.mxu0 %v1145_v20  ;;  %v1155_v20 = vld [vmem:[#allocation7 + $0x88] sm:$0xff] }
 0x441   :  { %2383 = vmatprep.subr.mxu0 %v1144_v21 }
 0x442   :  { %2384 = vmatpush3.msra.mxu0 %v1144_v21  ;;  %v1154_v21 = vld [vmem:[#allocation7 + $0x80] sm:$0xff] }
 0x443   :  { %2385 = vmatprep.subr.mxu0 %v1143_v22 }
 0x444   :  { %2386 = vmatpush3.msra.mxu0 %v1143_v22  ;;  %v1356_v22 = vld [vmem:[#allocation7 + $0x178] sm:$0xff] }
 0x445   :  { %2387 = vmatprep.subr.mxu0 %v1142_v23 }
 0x446   :  { %2388 = vmatpush3.msra.mxu0 %v1142_v23  ;;  %v1355_v23 = vld [vmem:[#allocation7 + $0x170] sm:$0xff] }
 0x447   :  { %2389 = vmatprep.subr.mxu0 %v1141_v24 }
 0x448   :  { %2390 = vmatpush3.msra.mxu0 %v1141_v24  ;;  %v1354_v24 = vld [vmem:[#allocation7 + $0x168] sm:$0xff] }
 0x449   :  { %2391 = vmatprep.subr.mxu0 %v1140_v25 }
 0x44a   :  { %2392 = vmatpush3.msra.mxu0 %v1140_v25  ;;  %v1353_v25 = vld [vmem:[#allocation7 + $0x160] sm:$0xff] }
 0x44b   :  { %2393 = vmatprep.subr.mxu0 %v1139_v26 }
 0x44c   :  { %2394 = vmatpush3.msra.mxu0 %v1139_v26  ;;  %v1352_v26 = vld [vmem:[#allocation7 + $0x158] sm:$0xff] }
 0x4f1   :  { %v926_v27 = vpop.f32.mrf.mxu0 }
 0x4f2   :  { %v930_v28 = vmul.f32 0.001953125, %v926_v27  ;;  %v1351_v27 = vld [vmem:[#allocation7 + $0x150] sm:$0xff] }
 0x4f3   :  { %v2300_v29 = vpop.f32.mrf.mxu0 }
 0x4f4   :  { %v931_v30 = vadd.f32 1e-05, %v930_v28  ;;  %v1350_v28 = vld [vmem:[#allocation7 + $0x148] sm:$0xff]  ;;  %v1349_v29 = vld [vmem:[#allocation7 + $0x140] sm:$0xff] }
 0x4f6   :  { %2546 = vrsqrt.f32 %v931_v30  ;;  %v1348_v30 = vld [vmem:[#allocation7 + $0x138] sm:$0xff] }
 0x503   :  { %v2547_v31 = vpop.eup %2546 }
 0x504   :  { %v936_v32 = vrot.slane %v2547_v31, %v2917_v54  ;;  %v1347_v31 = vld [vmem:[#allocation7 + $0x130] sm:$0xff] }
 0x506   :  { %v940_v51 = vmul.f32 %v936_v32, %v2921_v59  ;;  %v939_v52 = vmul.f32 %v936_v32, %v2924_v60  ;;  %v938_v53 = vmul.f32 %v936_v32, %v2929_v2  ;;  %v937_v55 = vmul.f32 %v936_v32, %v2934_v63  ;;  %v1138_v32 = vld [vmem:[#allocation7 + $0x8] sm:$0xff] }
 0x507   :  { %2395 = vmatprep.subr.mxu0 %v1138_v32 }
 0x508   :  { %v951_v57 = vmul.f32 %v1813_v50, %v940_v51  ;;  %v950_v58 = vmul.f32 %v1813_v50, %v939_v52  ;;  %v949_v61 = vmul.f32 %v1813_v50, %v938_v53  ;;  %v948_v1 = vmul.f32 %v1813_v50, %v937_v55  ;;  %v1346_v50 = vld [vmem:[#allocation7 + $0x128] sm:$0xff]  ;;  %2396 = vmatpush3.msra.mxu0 %v1138_v32  ;;  %v1137_v51 = vld [vmem:[#allocation7] sm:$0xff]  ;;  %v1344_v53 = vld [vmem:[#allocation7 + $0x118] sm:$0xff] }
 0x509   :  { %v1345_v52 = vld [vmem:[#allocation7 + $0x120] sm:$0xff]  ;;  %2397 = vmatprep.subr.mxu0 %v1137_v51  ;;  %v1343_v55 = vld [vmem:[#allocation7 + $0x110] sm:$0xff] }
 0x50a   :  { %v962_v62 = vadd.f32 %v1814_v56, %v951_v57  ;;  %v961_v0 = vadd.f32 %v1814_v56, %v950_v58  ;;  %v960_v4 = vadd.f32 %v1814_v56, %v949_v61  ;;  %v959_v60 = vadd.f32 %v1814_v56, %v948_v1  ;;  %2398 = vmatpush3.msra.mxu0 %v1137_v51  ;;  %v1342_v56 = vld [vmem:[#allocation7 + $0x108] sm:$0xff]  ;;  %v1341_v57 = vld [vmem:[#allocation7 + $0x100] sm:$0xff] }
 0x50b   :  { %2443 = vmatprep.subr.mxu0 %v2689_v7 }
 0x50c   :  { %v2990_v3 = vmax.f32 %v962_v62, 0.0  ;;  %v2993_v59 = vmax.f32 %v961_v0, 0.0  ;;  %v2997_v2 = vmax.f32 %v960_v4, 0.0  ;;  %v963_v63 = vmax.f32 %v959_v60, 0.0 }
 0x50e   :  { %2301 = vmatprep.subr.mxu1 %v2990_v3 }
 0x50f   :  { %2302 = vmatpush3.msra.mxu1 %v2990_v3 }
 0x510   :  { %2303 = vmatprep.subr.mxu1 %v2993_v59 }
 0x511   :  { %2304 = vmatpush3.msra.mxu1 %v2993_v59 }
 0x512   :  { %2305 = vmatprep.subr.mxu1 %v2997_v2 }
 0x513   :  { %2306 = vmatpush3.msra.mxu1 %v2997_v2 }
 0x514   :  { %2307 = vmatprep.subr.mxu1 %v963_v63 }
 0x515   :  { %2308 = vmatpush3.msra.mxu1 %v963_v63 }
 0x516   :  { %2310 = vmatmul.mubr.msk.f32.vlgmr.msra.gmra.mxu1 %vm114_vm0, %v2789_v5  ;;  %2315 = vmatprep.subr.mxu1 %v2990_v3  ;;  %v1169_v5 = vld [vmem:[#allocation7 + $0xf8] sm:$0xff] }
 0x517   :  { %2316 = vmatpush3.msra.mxu1 %v2990_v3  ;;  %2312 = vmatprep.mubr.msk.f32.mxu1 %vm114_vm0, %v2791_v6  ;;  %v1167_v6 = vld [vmem:[#allocation7 + $0xe8] sm:$0xff] }
 0x518   :  { %2317 = vmatprep.subr.mxu1 %v2993_v59 }
 0x519   :  { %2318 = vmatpush3.msra.mxu1 %v2993_v59 }
 0x51a   :  { %2313 = vmatmul.mubr.msk.f32.gmra.mxu1 %vm114_vm0, %v2799_v8  ;;  %2319 = vmatprep.subr.mxu1 %v2997_v2  ;;  %v1166_v8 = vld [vmem:[#allocation7 + $0xe0] sm:$0xff] }
 0x51b   :  { %2320 = vmatpush3.msra.mxu1 %v2997_v2  ;;  %2323 = vmatprep.mubr.msk.f32.mxu1 %vm114_vm0, %v2802_v9  ;;  %v1165_v9 = vld [vmem:[#allocation7 + $0xd8] sm:$0xff] }
 0x51c   :  { %2321 = vmatprep.subr.mxu1 %v963_v63 }
 0x51d   :  { %2322 = vmatpush3.msra.mxu1 %v963_v63 }
 0x51e   :  { %2324 = vmatmul.mubr.msk.f32.vlgmr.msra.gmra.mxu1 %vm114_vm0, %v2811_v11  ;;  %2329 = vmatprep.subr.mxu1 %v1169_v5  ;;  %v1163_v11 = vld [vmem:[#allocation7 + $0xc8] sm:$0xff] }
 0x51f   :  { %2330 = vmatpush3.msra.mxu1 %v1169_v5  ;;  %2326 = vmatprep.mubr.msk.f32.mxu1 %vm114_vm0, %v2813_v13  ;;  %v1162_v13 = vld [vmem:[#allocation7 + $0xc0] sm:$0xff] }
 0x520   :  { %2331 = vmatprep.subr.mxu1 %v1168_v10 }
 0x521   :  { %2332 = vmatpush3.msra.mxu1 %v1168_v10 }
 0x522   :  { %2327 = vmatmul.mubr.msk.f32.gmra.mxu1 %vm114_vm0, %v2819_v16  ;;  %2333 = vmatprep.subr.mxu1 %v1167_v6  ;;  %v1159_v16 = vld [vmem:[#allocation7 + $0xa8] sm:$0xff] }
 0x523   :  { %2334 = vmatpush3.msra.mxu1 %v1167_v6  ;;  %2361 = vmatprep.mubr.f32.mxu1 %v963_v63 }
 0x524   :  { %2335 = vmatprep.subr.mxu1 %v1166_v8 }
 0x525   :  { %2336 = vmatpush3.msra.mxu1 %v1166_v8 }
 0x526   :  { %2337 = vmatprep.subr.mxu1 %v1165_v9 }
 0x527   :  { %2338 = vmatpush3.msra.mxu1 %v1165_v9 }
 0x528   :  { %2339 = vmatprep.subr.mxu1 %v1164_v12 }
 0x529   :  { %2340 = vmatpush3.msra.mxu1 %v1164_v12 }
 0x52a   :  { %2341 = vmatprep.subr.mxu1 %v1163_v11 }
 0x52b   :  { %2342 = vmatpush3.msra.mxu1 %v1163_v11 }
 0x52c   :  { %2343 = vmatprep.subr.mxu1 %v1162_v13 }
 0x52d   :  { %2344 = vmatpush3.msra.mxu1 %v1162_v13 }
 0x52e   :  { %2345 = vmatprep.subr.mxu1 %v1161_v14 }
 0x52f   :  { %2346 = vmatpush3.msra.mxu1 %v1161_v14 }
 0x530   :  { %2347 = vmatprep.subr.mxu1 %v1160_v15 }
 0x531   :  { %2348 = vmatpush3.msra.mxu1 %v1160_v15 }
 0x532   :  { %2349 = vmatprep.subr.mxu1 %v1159_v16 }
 0x533   :  { %2350 = vmatpush3.msra.mxu1 %v1159_v16 }
 0x534   :  { %2351 = vmatprep.subr.mxu1 %v1158_v17 }
 0x535   :  { %2352 = vmatpush3.msra.mxu1 %v1158_v17 }
 0x536   :  { %2353 = vmatprep.subr.mxu1 %v1157_v18 }
 0x537   :  { %2354 = vmatpush3.msra.mxu1 %v1157_v18 }
 0x538   :  { %2355 = vmatprep.subr.mxu1 %v1156_v19 }
 0x539   :  { %2356 = vmatpush3.msra.mxu1 %v1156_v19 }
 0x53a   :  { %2357 = vmatprep.subr.mxu1 %v1155_v20 }
 0x53b   :  { %2358 = vmatpush3.msra.mxu1 %v1155_v20 }
 0x53c   :  { %2359 = vmatprep.subr.mxu1 %v1154_v21 }
 0x53d   :  { %2360 = vmatpush3.msra.mxu1 %v1154_v21 }
 0x53e   :  { %2362 = vmatmul.mubr.f32.vlgmr.msra.gmra.mxu1 %v2997_v2  ;;  %2405 = vmatprep.subr.mxu1 %v1356_v22 }
 0x53f   :  { %2364 = vmatprep.mubr.f32.mxu1 %v2993_v59  ;;  %2406 = vmatpush3.msra.mxu1 %v1356_v22 }
 0x540   :  { %2407 = vmatprep.subr.mxu1 %v1355_v23 }
 0x541   :  { %2408 = vmatpush3.msra.mxu1 %v1355_v23 }
 0x542   :  { %2365 = vmatmul.mubr.f32.gmra.mxu1 %v2990_v3  ;;  %2409 = vmatprep.subr.mxu1 %v1354_v24 }
 0x543   :  { %2410 = vmatpush3.msra.mxu1 %v1354_v24 }
 0x544   :  { %2411 = vmatprep.subr.mxu1 %v1353_v25 }
 0x545   :  { %2412 = vmatpush3.msra.mxu1 %v1353_v25 }
 0x546   :  { %2413 = vmatprep.subr.mxu1 %v1352_v26 }
 0x547   :  { %2414 = vmatpush3.msra.mxu1 %v1352_v26 }
 0x548   :  { %2415 = vmatprep.subr.mxu1 %v1351_v27 }
 0x549   :  { %2416 = vmatpush3.msra.mxu1 %v1351_v27 }
 0x54a   :  { %2417 = vmatprep.subr.mxu1 %v1350_v28 }
 0x54b   :  { %2418 = vmatpush3.msra.mxu1 %v1350_v28 }
 0x54c   :  { %2419 = vmatprep.subr.mxu1 %v1349_v29 }
 0x54d   :  { %2420 = vmatpush3.msra.mxu1 %v1349_v29 }
 0x54e   :  { %2421 = vmatprep.subr.mxu1 %v1348_v30 }
 0x54f   :  { %2422 = vmatpush3.msra.mxu1 %v1348_v30 }
 0x550   :  { %2423 = vmatprep.subr.mxu1 %v1347_v31 }
 0x551   :  { %2424 = vmatpush3.msra.mxu1 %v1347_v31 }
 0x552   :  { %2425 = vmatprep.subr.mxu1 %v1346_v50 }
 0x553   :  { %2426 = vmatpush3.msra.mxu1 %v1346_v50 }
 0x554   :  { %2427 = vmatprep.subr.mxu1 %v1345_v52 }
 0x555   :  { %2428 = vmatpush3.msra.mxu1 %v1345_v52 }
 0x556   :  { %2429 = vmatprep.subr.mxu1 %v1344_v53 }
 0x557   :  { %2430 = vmatpush3.msra.mxu1 %v1344_v53 }
 0x558   :  { %2431 = vmatprep.subr.mxu1 %v1343_v55 }
 0x559   :  { %2432 = vmatpush3.msra.mxu1 %v1343_v55 }
 0x55a   :  { %2433 = vmatprep.subr.mxu1 %v1342_v56 }
 0x55b   :  { %2434 = vmatpush3.msra.mxu1 %v1342_v56 }
 0x55c   :  { %2435 = vmatprep.subr.mxu1 %v1341_v57 }
 0x55d   :  { %2436 = vmatpush3.msra.mxu1 %v1341_v57 }
 0x55e   :  { %2489 = vmatprep.subr.mxu1 %v2689_v7 }
 0x5d6   :  { %v2311_v58 = vpop.f32.mrf.mxu1 }
 0x5d8   :  { %v1033_v61 = vpop.f32.mrf.mxu1 }
 0x5d9   :  { %2399 = vmatprep.mubr.f32.mxu0 %v1033_v61 }
 0x5da   :  { %v2314_v62 = vpop.f32.mrf.mxu1  ;;  %2400 = vmatmul.mubr.f32.vlgmr.msra.gmra.mxu0 %v2311_v58  ;;  %v2550_v58 = vld [vmem:[#allocation2] sm:$0xff] }
 0x5dc   :  { %v1043_v0 = vpop.f32.mrf.mxu1 }
 0x5dd   :  { %2402 = vmatprep.mubr.f32.mxu0 %v1043_v0 }
 0x5de   :  { %v2325_v1 = vpop.f32.mrf.mxu1  ;;  %2403 = vmatmul.mubr.f32.gmra.mxu0 %v2314_v62  ;;  %v2551_v62 = vld [vmem:[#allocation2 + $0x8] sm:$0xff] }
 0x5df   :  { %2451 = vmatprep.mubr.msk.f32.mxu0 %vm2690_vm1, %v2689_v7 }
 0x5e0   :  { %v1118_v3 = vpop.f32.mrf.mxu1 }
 0x5e1   :  { %2437 = vmatprep.mubr.f32.mxu1 %v1118_v3 }
 0x5e2   :  { %v2328_v4 = vpop.f32.mrf.mxu1  ;;  %2438 = vmatmul.mubr.f32.vlgmr.msra.gmra.mxu1 %v2325_v1  ;;  %v2552_v1 = vld [vmem:[#allocation2 + $0x10] sm:$0xff] }
 0x5e4   :  { %v1128_v59 = vpop.f32.mrf.mxu1 }
 0x5e5   :  { %2440 = vmatprep.mubr.f32.mxu1 %v1128_v59 }
 0x5e6   :  { %2441 = vmatmul.mubr.f32.gmra.mxu1 %v2328_v4  ;;  %v2553_v4 = vld [vmem:[#allocation2 + $0x18] sm:$0xff] }
 0x5e7   :  { %2497 = vmatprep.mubr.msk.f32.mxu1 %vm2690_vm1, %v2689_v7 }
 0x5fe   :  { %v2363_v60 = vpop.f32.mrf.mxu1 }
 0x600   :  { %v1236_v2 = vpop.f32.mrf.mxu1 }
 0x602   :  { %v2366_v5 = vpop.f32.mrf.mxu1 }
 0x604   :  { %v1246_v6 = vpop.f32.mrf.mxu1 }
 0x69a   :  { %v2401_v63 = vpop.f32.mrf.mxu0 }
 0x69b   :  { %v1327_v18 = vadd.f32 %v2401_v63, %v2363_v60 }
 0x69c   :  { %v1321_v10 = vpop.f32.mrf.mxu0 }
 0x69d   :  { %v1322_v20 = vadd.f32 %v1321_v10, %v1236_v2 }
 0x69e   :  { %v2404_v8 = vpop.f32.mrf.mxu0 }
 0x69f   :  { %v1337_v13 = vadd.f32 %v2404_v8, %v2366_v5 }
 0x6a0   :  { %v1331_v12 = vpop.f32.mrf.mxu0 }
 0x6a1   :  { %v1332_v15 = vadd.f32 %v1331_v12, %v1246_v6 }
 0x6a2   :  { %v2439_v9 = vpop.f32.mrf.mxu1 }
 0x6a3   :  { %v1443_v21 = vadd.f32 %v2439_v9, %v1327_v18 }
 0x6a4   :  { %v1423_v11 = vpop.f32.mrf.mxu1 }
 0x6a5   :  { %v1442_v22 = vadd.f32 %v1423_v11, %v1322_v20 }
 0x6a6   :  { %v2442_v14 = vpop.f32.mrf.mxu1 }
 0x6a7   :  { %v1445_v16 = vadd.f32 %v2442_v14, %v1337_v13 }
 0x6a8   :  { %v1433_v17 = vpop.f32.mrf.mxu1 }
 0x6a9   :  { %v1444_v19 = vadd.f32 %v1433_v17, %v1332_v15  ;;  %2444 = vmatpush3.msra.mxu0 %v1445_v16 }
 0x6aa   :  { %2445 = vmatprep.subr.mxu0 %v2689_v7 }
 0x6ab   :  { %2446 = vmatpush3.msra.mxu0 %v1444_v19 }
 0x6ac   :  { %2447 = vmatprep.subr.mxu0 %v2689_v7 }
 0x6ad   :  { %2448 = vmatpush3.msra.mxu0 %v1443_v21 }
 0x6ae   :  { %2449 = vmatprep.subr.mxu0 %v2689_v7 }
 0x6af   :  { %2450 = vmatpush3.msra.mxu0 %v1442_v22 }
 0x6b0   :  { %2452 = vmatmul.mubr.msk.f32.vlgmr.msra.gmra.mxu0 %vm114_vm0, %v2691_v34  ;;  %2454 = vmatprep.subr.mxu0 %v2689_v7 }
 0x6b1   :  { %2455 = vmatpush3.msra.mxu0 %v2846_v33  ;;  %2486 = vmatprep.mubr.msk.f32.mxu0 %vm2690_vm1, %v2689_v7 }
 0x6b2   :  { %2456 = vmatprep.subr.mxu0 %v2689_v7 }
 0x6b3   :  { %2457 = vmatpush3.msra.mxu0 %v2852_v35 }
 0x6b4   :  { %2458 = vmatprep.subr.mxu0 %v2689_v7 }
 0x6b5   :  { %2459 = vmatpush3.msra.mxu0 %v2858_v36 }
 0x6b6   :  { %2460 = vmatprep.subr.mxu0 %v2689_v7 }
 0x6b7   :  { %2461 = vmatpush3.msra.mxu0 %v2862_v37 }
 0x6b8   :  { %2462 = vmatprep.subr.mxu0 %v2689_v7 }
 0x6b9   :  { %2463 = vmatpush3.msra.mxu0 %v2866_v38 }
 0x6ba   :  { %2464 = vmatprep.subr.mxu0 %v2689_v7 }
 0x6bb   :  { %2465 = vmatpush3.msra.mxu0 %v2870_v39 }
 0x6bc   :  { %2466 = vmatprep.subr.mxu0 %v2689_v7 }
 0x6bd   :  { %2467 = vmatpush3.msra.mxu0 %v2874_v40 }
 0x6be   :  { %2468 = vmatprep.subr.mxu0 %v2689_v7 }
 0x6bf   :  { %2469 = vmatpush3.msra.mxu0 %v2878_v41 }
 0x6c0   :  { %2470 = vmatprep.subr.mxu0 %v2689_v7 }
 0x6c1   :  { %2471 = vmatpush3.msra.mxu0 %v2882_v42 }
 0x6c2   :  { %2472 = vmatprep.subr.mxu0 %v2689_v7 }
 0x6c3   :  { %2473 = vmatpush3.msra.mxu0 %v2886_v43 }
 0x6c4   :  { %2474 = vmatprep.subr.mxu0 %v2689_v7 }
 0x6c5   :  { %2475 = vmatpush3.msra.mxu0 %v2890_v44 }
 0x6c6   :  { %2476 = vmatprep.subr.mxu0 %v2689_v7 }
 0x6c7   :  { %2477 = vmatpush3.msra.mxu0 %v2894_v45 }
 0x6c8   :  { %2478 = vmatprep.subr.mxu0 %v2689_v7 }
 0x6c9   :  { %2479 = vmatpush3.msra.mxu0 %v2898_v46 }
 0x6ca   :  { %2480 = vmatprep.subr.mxu0 %v2689_v7 }
 0x6cb   :  { %2481 = vmatpush3.msra.mxu0 %v2902_v47 }
 0x6cc   :  { %2482 = vmatprep.subr.mxu0 %v2689_v7 }
 0x6cd   :  { %2483 = vmatpush3.msra.mxu0 %v2906_v48 }
 0x6ce   :  { %2484 = vmatprep.subr.mxu0 %v2689_v7 }
 0x6cf   :  { %2485 = vmatpush3.msra.mxu0 %v2912_v49 }
 0x770   :  { %v1512_v23 = vpop.f32.mrf.mxu0 }
 0x771   :  { %2487 = vmatmul.mubr.f32.vlgmr.msra.gmra.mxu0 %v1512_v23 }
 0x772   :  { %v2453_v24 = vpop.f32.mrf.mxu0 }
 0x831   :  { %v1582_v25 = vpop.f32.mrf.mxu0 }
 0x832   :  { %v1586_v26 = vmul.f32 0.001953125, %v1582_v25 }
 0x833   :  { %v2488_v27 = vpop.f32.mrf.mxu0 }
 0x834   :  { %v1590_v28 = vrot.slane %v1586_v26, %v2917_v54 }
 0x836   :  { %v3071_v29 = vsub.f32 %v1445_v16, %v1590_v28  ;;  %v1593_v30 = vsub.f32 %v1444_v19, %v1590_v28  ;;  %v1592_v32 = vsub.f32 %v1443_v21, %v1590_v28  ;;  %v1591_v51 = vsub.f32 %v1442_v22, %v1590_v28 }
 0x838   :  { %v1598_v31 = vmul.f32 %v3071_v29, %v3071_v29  ;;  %v1597_v50 = vmul.f32 %v1593_v30, %v1593_v30  ;;  %v1596_v52 = vmul.f32 %v1592_v32, %v1592_v32  ;;  %v1595_v53 = vmul.f32 %v1591_v51, %v1591_v51 }
 0x83a   :  { %2490 = vmatpush3.msra.mxu1 %v1598_v31 }
 0x83b   :  { %2491 = vmatprep.subr.mxu1 %v2689_v7 }
 0x83c   :  { %2492 = vmatpush3.msra.mxu1 %v1597_v50 }
 0x83d   :  { %2493 = vmatprep.subr.mxu1 %v2689_v7 }
 0x83e   :  { %2494 = vmatpush3.msra.mxu1 %v1596_v52 }
 0x83f   :  { %2495 = vmatprep.subr.mxu1 %v2689_v7 }
 0x840   :  { %2496 = vmatpush3.msra.mxu1 %v1595_v53 }
 0x841   :  { %2498 = vmatmul.mubr.msk.f32.vlgmr.msra.gmra.mxu1 %vm114_vm0, %v2691_v34  ;;  %2500 = vmatprep.subr.mxu1 %v2689_v7 }
 0x842   :  { %2501 = vmatpush3.msra.mxu1 %v2846_v33  ;;  %2532 = vmatprep.mubr.msk.f32.mxu1 %vm2690_vm1, %v2689_v7 }
 0x843   :  { %2502 = vmatprep.subr.mxu1 %v2689_v7 }
 0x844   :  { %2503 = vmatpush3.msra.mxu1 %v2852_v35 }
 0x845   :  { %2504 = vmatprep.subr.mxu1 %v2689_v7 }
 0x846   :  { %2505 = vmatpush3.msra.mxu1 %v2858_v36 }
 0x847   :  { %2506 = vmatprep.subr.mxu1 %v2689_v7 }
 0x848   :  { %2507 = vmatpush3.msra.mxu1 %v2862_v37 }
 0x849   :  { %2508 = vmatprep.subr.mxu1 %v2689_v7 }
 0x84a   :  { %2509 = vmatpush3.msra.mxu1 %v2866_v38 }
 0x84b   :  { %2510 = vmatprep.subr.mxu1 %v2689_v7 }
 0x84c   :  { %2511 = vmatpush3.msra.mxu1 %v2870_v39 }
 0x84d   :  { %2512 = vmatprep.subr.mxu1 %v2689_v7 }
 0x84e   :  { %2513 = vmatpush3.msra.mxu1 %v2874_v40 }
 0x84f   :  { %2514 = vmatprep.subr.mxu1 %v2689_v7 }
 0x850   :  { %2515 = vmatpush3.msra.mxu1 %v2878_v41  ;;  %v1825_v41 = vld [vmem:[%s3135_s7] ss:$0 sm:$0xff]  ;;  %s2654_s7 = scalar_lea.vmem %s1790_s19, 512 }
 0x851   :  { %2516 = vmatprep.subr.mxu1 %v2689_v7  ;;  %p2655_p11 = scmp.ne.s32.totalorder %s1790_s19, %s2654_s7  ;;  %p2660_p13 = scmp.lt.s32.totalorder %s2654_s7, %s2654_s7 }
 0x852   :  { %2517 = vmatpush3.msra.mxu1 %v2882_v42 }
 0x853   :  { %2518 = vmatprep.subr.mxu1 %v2689_v7  ;;  %p2661_p0 = por %p2660_p13, %p2659_p12 }
 0x854   :  { %2519 = vmatpush3.msra.mxu1 %v2886_v43 }
 0x855   :  { %2520 = vmatprep.subr.mxu1 %v2689_v7  ;;  %p2662_p1 = pnand %p2661_p0, %p2655_p11 }
 0x856   :  { %2521 = vmatpush3.msra.mxu1 %v2890_v44 }
 0x857   :  { %2522 = vmatprep.subr.mxu1 %v2689_v7 }
 0x858   :  { %2523 = vmatpush3.msra.mxu1 %v2894_v45  ;;  %v1826_v45 = vld [vmem:[%s3136_s8] ss:$0 sm:$0xff] }
 0x859   :  { %2524 = vmatprep.subr.mxu1 %v2689_v7 }
 0x85a   :  { %2525 = vmatpush3.msra.mxu1 %v2898_v46 }
 0x85b   :  { %2526 = vmatprep.subr.mxu1 %v2689_v7 }
 0x85c   :  { %2527 = vmatpush3.msra.mxu1 %v2902_v47 }
 0x85d   :  { %2528 = vmatprep.subr.mxu1 %v2689_v7 }
 0x85e   :  { %2529 = vmatpush3.msra.mxu1 %v2906_v48 }
 0x85f   :  { %2530 = vmatprep.subr.mxu1 %v2689_v7 }
 0x860   :  { %2531 = vmatpush3.msra.mxu1 %v2912_v49 }
 0x901   :  { %v1665_v33 = vpop.f32.mrf.mxu1 }
 0x902   :  { %2533 = vmatmul.mubr.f32.vlgmr.msra.gmra.mxu1 %v1665_v33 }
 0x903   :  { %v2499_v34 = vpop.f32.mrf.mxu1 }
 0x9c2   :  { %v1735_v35 = vpop.f32.mrf.mxu1 }
 0x9c3   :  { %v1739_v36 = vmul.f32 0.001953125, %v1735_v35 }
 0x9c4   :  { %v2534_v37 = vpop.f32.mrf.mxu1 }
 0x9c5   :  { %v1740_v38 = vadd.f32 1e-05, %v1739_v36 }
 0x9c7   :  { %2548 = vrsqrt.f32 %v1740_v38 }
 0x9d4   :  { %v2549_v39 = vpop.eup %2548 }
 0x9d5   :  { %v1745_v40 = vrot.slane %v2549_v39, %v2917_v54 }
 0x9d7   :  { %v1746_v42 = vmul.f32 %v1745_v40, %v1591_v51  ;;  %v1747_v43 = vmul.f32 %v1745_v40, %v1592_v32  ;;  %v1748_v7 = vmul.f32 %v1745_v40, %v1593_v30  ;;  %v1749_v44 = vmul.f32 %v1745_v40, %v3071_v29 }
 0x9d9   :  { %v1757_v46 = vmul.f32 %v1825_v41, %v1746_v42  ;;  %v1758_v47 = vmul.f32 %v1825_v41, %v1747_v43  ;;  %v1759_v48 = vmul.f32 %v1825_v41, %v1748_v7  ;;  %v1760_v49 = vmul.f32 %v1825_v41, %v1749_v44 }
 0x9db   :  { %v1768_v55 = vadd.f32 %v1826_v45, %v1757_v46  ;;  %v1769_v56 = vadd.f32 %v1826_v45, %v1758_v47  ;;  %v1770_v54 = vadd.f32 %v1826_v45, %v1759_v48  ;;  %v1771_v57 = vadd.f32 %v1826_v45, %v1760_v49 }
 0x9dd   :  { %v1772_v61 = vadd.f32 %v2550_v58, %v1768_v55  ;;  %v1773_v0 = vadd.f32 %v2551_v62, %v1769_v56  ;;  %v1774_v3 = vadd.f32 %v2552_v1, %v1770_v54  ;;  %v1775_v59 = vadd.f32 %v2553_v4, %v1771_v57 }
 0x9df   :  { %v1776_v60 = vmax.f32 %v1772_v61, 0.0  ;;  %v1777_v2 = vmax.f32 %v1773_v0, 0.0  ;;  %v1778_v63 = vmax.f32 %v1774_v3, 0.0  ;;  %v1779_v5 = vmax.f32 %v1775_v59, 0.0 }
 0x9e1   :  { %1780 = vst [vmem:[#allocation11] sm:$0xff] %v1776_v60  ;;  %1781 = vst [vmem:[#allocation11 + $0x8] sm:$0xff] %v1777_v2 }
 0x9e2   :  { %1782 = vst [vmem:[#allocation11 + $0x10] sm:$0xff] %v1778_v63  ;;  %1783 = vst [vmem:[#allocation11 + $0x18] sm:$0xff] %v1779_v5 }
 0x9e3   :  { %2665 = shalt.err (!%p2662_p1)
}
 0x9e4   :  { %1795 = dma.vmem_to_hbm [thread:$0]  %s1790_s19, 512, %s3137_s9, [#allocation4], %s2684_s14, %s2684_s14, %s2685_s15  }
 0x9e5   :  { %2680 = dma.done.wait [#allocation4], 512  }
 0x9e6   :  { %2681 = vsyncadd [#allocation4], 4294966784 }
 0x9e7   :  { %1799 = vsyncpa [#allocation3], 1 }
 0x9e8   :  { %1800 = vsyncpa [#allocation6], 1 }
 0x9e9   :  { %1801 = vsyncpa [#allocation9], 1 }
 0x9ea   :  { %1802 = vsyncpa [#allocation4], 1 }

</bundles_post_ra>
